<compile_context>
chip_gen: v7x
topology: tpu7x:2x2x1
jax: 0.10.0
libtpu: 0.0.40
codegen_flags: <defaults>
</compile_context>

<pallas_src>
import jax
import jax.numpy as jnp
from jax.experimental import pallas as pl
from jax.experimental.pallas import tpu as pltpu

HIDDEN = 32
NUM_LAYERS = 2
INPUT_SIZE = 1
OUTPUT_SIZE = 1
OUT_PAD = 128          # lane-dense output width (real output in column 0)


def lstm_model_kernel(x_ref, w1_ref, b1_ref,
                      wih0_ref, whh0_ref, bg0_ref,
                      w1f_ref, bg1_ref,
                      w2_ref, b2_ref,
                      out_ref):
    """Whole forward pass, single grid point, everything resident in VMEM.

    x_ref  : (T*B, 1)  time-major flattened input (row r = t*B + b)
    w1_ref : (1, H)    linear_1 weight (input_size = 1)
    b1_ref : (1, H)    linear_1 bias
    wih0_ref: (H, 4H)  weight_ih_l0^T
    whh0_ref: (H, 4H)  weight_hh_l0^T
    bg0_ref : (1, 4H)  bias_ih_l0 + bias_hh_l0
    w1f_ref : (2H, 4H) [weight_ih_l1^T ; weight_hh_l1^T]  (fused layer-1 weight)
    bg1_ref : (1, 4H)  bias_ih_l1 + bias_hh_l1
    w2_ref  : (1, 2H)  linear_2 weight (row vector)
    b2_ref  : (1, 1)   linear_2 bias
    out_ref : (B, OUT_PAD) prediction broadcast across lanes (col 0 is real)
    """
    B = out_ref.shape[0]
    TB = x_ref.shape[0]
    T = TB // B
    H = w1_ref.shape[1]

    # ---- Hoisted input path: linear_1 -> ReLU -> ih-projection, all T at once.
    x_flat = x_ref[...]                                       # (T*B, 1)
    inp = jnp.maximum(x_flat * w1_ref[...] + b1_ref[...], 0.0)  # (T*B, H)
    g0_all = (jnp.dot(inp, wih0_ref[...],
                      preferred_element_type=jnp.float32)
              + bg0_ref[...])                                 # (T*B, 4H)

    whh0 = whh0_ref[...]                                      # (H, 4H)
    w1f = w1f_ref[...]                                        # (2H, 4H)
    bg1 = bg1_ref[...]                                        # (1, 4H)

    def gate_math(g):
        # Two full-width EUP passes, then static lane slices.
        sig = jax.nn.sigmoid(g)                               # (B, 4H)
        tnh = jnp.tanh(g)                                     # (B, 4H)
        i = sig[:, 0 * H:1 * H]
        f = sig[:, 1 * H:2 * H]
        gg = tnh[:, 2 * H:3 * H]
        o = sig[:, 3 * H:4 * H]
        return i, f, gg, o

    h0 = jnp.zeros((B, H), jnp.float32)
    c0 = jnp.zeros((B, H), jnp.float32)
    h1 = jnp.zeros((B, H), jnp.float32)
    c1 = jnp.zeros((B, H), jnp.float32)

    # ---- Fully unrolled recurrence (T is static and small).
    for t in range(T):
        # LSTM layer 0: only the recurrent matmul is on the serial chain.
        g0 = g0_all[t * B:(t + 1) * B, :] + jnp.dot(
            h0, whh0, preferred_element_type=jnp.float32)
        i0, f0, gg0, o0 = gate_math(g0)
        c0 = f0 * c0 + i0 * gg0
        h0 = o0 * jnp.tanh(c0)

        # LSTM layer 1: single fused matmul on concat([h0, h1]).
        g1 = jnp.dot(jnp.concatenate([h0, h1], axis=1), w1f,
                     preferred_element_type=jnp.float32) + bg1
        i1, f1, gg1, o1 = gate_math(g1)
        c1 = f1 * c1 + i1 * gg1
        h1 = o1 * jnp.tanh(c1)

    # h_n.permute(1,0,2).reshape(B, -1) == [h0 | h1] along features -> (B, 2H)
    # TODO(synk): nn.Dropout is identity in eval mode; not applied here.
    h_cat = jnp.concatenate([h0, h1], axis=1)                 # (B, 2H)
    pred = (jnp.sum(h_cat * w2_ref[...], axis=-1, keepdims=True)
            + b2_ref[...])                                    # (B, 1)
    # Lane-dense store; wrapper extracts column 0.
    out_ref[...] = jnp.broadcast_to(pred, out_ref.shape)


def init_params(key, hidden=HIDDEN, input_size=INPUT_SIZE, output_size=OUTPUT_SIZE):
    """Deterministic parameter init matching the PyTorch shapes.

    LSTM biases are zero (as in init_weights); weight_ih ~ kaiming-style normal,
    weight_hh ~ orthogonal; linear layers use small uniform init.
    """
    ks = jax.random.split(key, 8)
    H = hidden

    def orth(k, n):
        a = jax.random.normal(k, (n, n), jnp.float32)
        q, _ = jnp.linalg.qr(a)
        return q

    w1 = jax.random.uniform(ks[0], (H, input_size), jnp.float32, -1.0, 1.0)
    b1 = jax.random.uniform(ks[1], (H,), jnp.float32, -1.0, 1.0)

    std = (2.0 / H) ** 0.5
    wih0 = std * jax.random.normal(ks[2], (4 * H, H), jnp.float32)
    whh0 = jnp.concatenate([orth(jax.random.fold_in(ks[3], g), H)
                            for g in range(4)], axis=0)
    wih1 = std * jax.random.normal(ks[4], (4 * H, H), jnp.float32)
    whh1 = jnp.concatenate([orth(jax.random.fold_in(ks[5], g), H)
                            for g in range(4)], axis=0)
    bg0 = jnp.zeros((4 * H,), jnp.float32)   # bias_ih_l0 + bias_hh_l0 (zeros)
    bg1 = jnp.zeros((4 * H,), jnp.float32)   # bias_ih_l1 + bias_hh_l1 (zeros)

    w2 = jax.random.uniform(ks[6], (output_size, NUM_LAYERS * H), jnp.float32, -0.1, 0.1)
    b2 = jax.random.uniform(ks[7], (output_size,), jnp.float32, -0.1, 0.1)

    return dict(w1=w1, b1=b1, wih0=wih0, whh0=whh0, bg0=bg0,
                wih1=wih1, whh1=whh1, bg1=bg1, w2=w2, b2=b2)


def lstm_model_forward(x, p):
    """x: (B, T, 1) float32 -> (B,) predictions[:, -1] (output_size == 1)."""
    B, T, _ = x.shape
    H = HIDDEN

    # Layout plumbing (no compute hoisted): time-major, row-flattened input.
    x_tm = jnp.transpose(x[:, :, 0]).astype(jnp.float32).reshape(T * B, 1)

    w1 = p["w1"].T                                        # (1, H)
    b1 = p["b1"].reshape(1, H)
    wih0 = p["wih0"].T                                    # (H, 4H)
    whh0 = p["whh0"].T                                    # (H, 4H)
    bg0 = p["bg0"].reshape(1, 4 * H)
    w1f = jnp.concatenate([p["wih1"].T, p["whh1"].T], axis=0)   # (2H, 4H)
    bg1 = p["bg1"].reshape(1, 4 * H)
    w2v = p["w2"].reshape(1, NUM_LAYERS * H)              # (1, 2H)
    b2 = p["b2"].reshape(1, 1)

    vmem = pl.BlockSpec(memory_space=pltpu.MemorySpace.VMEM)
    out = pl.pallas_call(
        lstm_model_kernel,
        out_shape=jax.ShapeDtypeStruct((B, OUT_PAD), jnp.float32),
        in_specs=[vmem] * 10,
        out_specs=vmem,
    )(x_tm, w1, b1, wih0, whh0, bg0, w1f, bg1, w2v, b2)
    # predictions[:, -1] with output_size == 1  ->  column 0 of the padded slab.
    return out[:, 0]                                      # (B,)


if __name__ == "__main__":
    B, T = 2, 8
    key = jax.random.PRNGKey(0)
    x = jax.random.normal(key, (B, T, INPUT_SIZE), jnp.float32)
    params = init_params(jax.random.PRNGKey(42))

    preds = lstm_model_forward(x, params)
    jax.block_until_ready(preds)
    assert preds.shape == (B,)
    print("KERNEL_OK")
</pallas_src>

<mosaic_0001>
module attributes {stable_mosaic.version = 11 : i64} {
  func.func @lstm_model_kernel(%arg0: memref<16x1xf32, #tpu.memory_space<vmem>>, %arg1: memref<1x32xf32, #tpu.memory_space<vmem>>, %arg2: memref<1x32xf32, #tpu.memory_space<vmem>>, %arg3: memref<32x128xf32, #tpu.memory_space<vmem>>, %arg4: memref<32x128xf32, #tpu.memory_space<vmem>>, %arg5: memref<1x128xf32, #tpu.memory_space<vmem>>, %arg6: memref<64x128xf32, #tpu.memory_space<vmem>>, %arg7: memref<1x128xf32, #tpu.memory_space<vmem>>, %arg8: memref<1x64xf32, #tpu.memory_space<vmem>>, %arg9: memref<1x1xf32, #tpu.memory_space<vmem>>, %arg10: memref<2x128xf32, #tpu.memory_space<vmem>>) attributes {dimension_semantics = [], scalar_prefetch = 0 : i64, scratch_operands = 0 : i64, tpu.core_type = #tpu.core_type<tc>} {
    %c0 = arith.constant 0 : index
    %c0_0 = arith.constant 0 : index
    %0 = vector.load %arg0[%c0, %c0_0] : memref<16x1xf32, #tpu.memory_space<vmem>>, vector<16x1xf32>
    %c0_1 = arith.constant 0 : index
    %c0_2 = arith.constant 0 : index
    %1 = vector.load %arg1[%c0_1, %c0_2] : memref<1x32xf32, #tpu.memory_space<vmem>>, vector<1x32xf32>
    %2 = vector.broadcast %0 : vector<16x1xf32> to vector<16x32xf32>
    %3 = vector.broadcast %1 : vector<1x32xf32> to vector<16x32xf32>
    %4 = arith.mulf %2, %3 : vector<16x32xf32>
    %c0_3 = arith.constant 0 : index
    %c0_4 = arith.constant 0 : index
    %5 = vector.load %arg2[%c0_3, %c0_4] : memref<1x32xf32, #tpu.memory_space<vmem>>, vector<1x32xf32>
    %6 = vector.broadcast %5 : vector<1x32xf32> to vector<16x32xf32>
    %7 = arith.addf %4, %6 : vector<16x32xf32>
    %cst = arith.constant 0.000000e+00 : f32
    %8 = vector.broadcast %cst : f32 to vector<16x32xf32>
    %9 = arith.maximumf %7, %8 : vector<16x32xf32>
    %c0_5 = arith.constant 0 : index
    %c0_6 = arith.constant 0 : index
    %10 = vector.load %arg3[%c0_5, %c0_6] : memref<32x128xf32, #tpu.memory_space<vmem>>, vector<32x128xf32>
    %cst_7 = arith.constant dense<0.000000e+00> : vector<16x128xf32>
    %11 = tpu.matmul %9, %10, %cst_7 {dimension_numbers = #tpu.dot_dimension_numbers<[1], [0], [0], [1], [0, 0, 1, 1], [], []>} : vector<16x32xf32>, vector<32x128xf32>, vector<16x128xf32> -> vector<16x128xf32>
    %c0_8 = arith.constant 0 : index
    %c0_9 = arith.constant 0 : index
    %12 = vector.load %arg5[%c0_8, %c0_9] : memref<1x128xf32, #tpu.memory_space<vmem>>, vector<1x128xf32>
    %13 = vector.broadcast %12 : vector<1x128xf32> to vector<16x128xf32>
    %14 = arith.addf %11, %13 : vector<16x128xf32>
    %c0_10 = arith.constant 0 : index
    %c0_11 = arith.constant 0 : index
    %15 = vector.load %arg4[%c0_10, %c0_11] : memref<32x128xf32, #tpu.memory_space<vmem>>, vector<32x128xf32>
    %c0_12 = arith.constant 0 : index
    %c0_13 = arith.constant 0 : index
    %16 = vector.load %arg6[%c0_12, %c0_13] : memref<64x128xf32, #tpu.memory_space<vmem>>, vector<64x128xf32>
    %c0_14 = arith.constant 0 : index
    %c0_15 = arith.constant 0 : index
    %17 = vector.load %arg7[%c0_14, %c0_15] : memref<1x128xf32, #tpu.memory_space<vmem>>, vector<1x128xf32>
    %cst_16 = arith.constant 0.000000e+00 : f32
    %18 = vector.broadcast %cst_16 : f32 to vector<2x32xf32>
    %cst_17 = arith.constant 0.000000e+00 : f32
    %19 = vector.broadcast %cst_17 : f32 to vector<2x32xf32>
    %cst_18 = arith.constant 0.000000e+00 : f32
    %20 = vector.broadcast %cst_18 : f32 to vector<2x32xf32>
    %cst_19 = arith.constant 0.000000e+00 : f32
    %21 = vector.broadcast %cst_19 : f32 to vector<2x32xf32>
    %22 = vector.extract_strided_slice %14 {offsets = [0, 0], sizes = [2, 128], strides = [1, 1]} : vector<16x128xf32> to vector<2x128xf32>
    %cst_20 = arith.constant dense<0.000000e+00> : vector<2x128xf32>
    %23 = tpu.matmul %18, %15, %cst_20 {dimension_numbers = #tpu.dot_dimension_numbers<[1], [0], [0], [1], [0, 0, 1, 1], [], []>} : vector<2x32xf32>, vector<32x128xf32>, vector<2x128xf32> -> vector<2x128xf32>
    %24 = arith.addf %22, %23 : vector<2x128xf32>
    %25 = arith.negf %24 : vector<2x128xf32>
    %26 = math.exp %25 : vector<2x128xf32>
    %cst_21 = arith.constant 1.000000e+00 : f32
    %27 = vector.broadcast %cst_21 : f32 to vector<2x128xf32>
    %28 = arith.addf %27, %26 : vector<2x128xf32>
    %29 = arith.divf %27, %28 : vector<2x128xf32>
    %30 = math.tanh %24 : vector<2x128xf32>
    %31 = vector.extract_strided_slice %29 {offsets = [0, 0], sizes = [2, 32], strides = [1, 1]} : vector<2x128xf32> to vector<2x32xf32>
    %32 = vector.extract_strided_slice %29 {offsets = [0, 32], sizes = [2, 32], strides = [1, 1]} : vector<2x128xf32> to vector<2x32xf32>
    %33 = vector.extract_strided_slice %30 {offsets = [0, 64], sizes = [2, 32], strides = [1, 1]} : vector<2x128xf32> to vector<2x32xf32>
    %34 = vector.extract_strided_slice %29 {offsets = [0, 96], sizes = [2, 32], strides = [1, 1]} : vector<2x128xf32> to vector<2x32xf32>
    %35 = arith.mulf %32, %19 : vector<2x32xf32>
    %36 = arith.mulf %31, %33 : vector<2x32xf32>
    %37 = arith.addf %35, %36 : vector<2x32xf32>
    %38 = math.tanh %37 : vector<2x32xf32>
    %39 = arith.mulf %34, %38 : vector<2x32xf32>
    %40 = tpu.concatenate %39, %20 in 1 : vector<2x32xf32>, vector<2x32xf32> -> vector<2x64xf32>
    %cst_22 = arith.constant dense<0.000000e+00> : vector<2x128xf32>
    %41 = tpu.matmul %40, %16, %cst_22 {dimension_numbers = #tpu.dot_dimension_numbers<[1], [0], [0], [1], [0, 0, 1, 1], [], []>} : vector<2x64xf32>, vector<64x128xf32>, vector<2x128xf32> -> vector<2x128xf32>
    %42 = vector.broadcast %17 : vector<1x128xf32> to vector<2x128xf32>
    %43 = arith.addf %41, %42 : vector<2x128xf32>
    %44 = arith.negf %43 : vector<2x128xf32>
    %45 = math.exp %44 : vector<2x128xf32>
    %cst_23 = arith.constant 1.000000e+00 : f32
    %46 = vector.broadcast %cst_23 : f32 to vector<2x128xf32>
    %47 = arith.addf %46, %45 : vector<2x128xf32>
    %48 = arith.divf %46, %47 : vector<2x128xf32>
    %49 = math.tanh %43 : vector<2x128xf32>
    %50 = vector.extract_strided_slice %48 {offsets = [0, 0], sizes = [2, 32], strides = [1, 1]} : vector<2x128xf32> to vector<2x32xf32>
    %51 = vector.extract_strided_slice %48 {offsets = [0, 32], sizes = [2, 32], strides = [1, 1]} : vector<2x128xf32> to vector<2x32xf32>
    %52 = vector.extract_strided_slice %49 {offsets = [0, 64], sizes = [2, 32], strides = [1, 1]} : vector<2x128xf32> to vector<2x32xf32>
    %53 = vector.extract_strided_slice %48 {offsets = [0, 96], sizes = [2, 32], strides = [1, 1]} : vector<2x128xf32> to vector<2x32xf32>
    %54 = arith.mulf %51, %21 : vector<2x32xf32>
    %55 = arith.mulf %50, %52 : vector<2x32xf32>
    %56 = arith.addf %54, %55 : vector<2x32xf32>
    %57 = math.tanh %56 : vector<2x32xf32>
    %58 = arith.mulf %53, %57 : vector<2x32xf32>
    %59 = vector.extract_strided_slice %14 {offsets = [2, 0], sizes = [2, 128], strides = [1, 1]} : vector<16x128xf32> to vector<2x128xf32>
    %cst_24 = arith.constant dense<0.000000e+00> : vector<2x128xf32>
    %60 = tpu.matmul %39, %15, %cst_24 {dimension_numbers = #tpu.dot_dimension_numbers<[1], [0], [0], [1], [0, 0, 1, 1], [], []>} : vector<2x32xf32>, vector<32x128xf32>, vector<2x128xf32> -> vector<2x128xf32>
    %61 = arith.addf %59, %60 : vector<2x128xf32>
    %62 = arith.negf %61 : vector<2x128xf32>
    %63 = math.exp %62 : vector<2x128xf32>
    %cst_25 = arith.constant 1.000000e+00 : f32
    %64 = vector.broadcast %cst_25 : f32 to vector<2x128xf32>
    %65 = arith.addf %64, %63 : vector<2x128xf32>
    %66 = arith.divf %64, %65 : vector<2x128xf32>
    %67 = math.tanh %61 : vector<2x128xf32>
    %68 = vector.extract_strided_slice %66 {offsets = [0, 0], sizes = [2, 32], strides = [1, 1]} : vector<2x128xf32> to vector<2x32xf32>
    %69 = vector.extract_strided_slice %66 {offsets = [0, 32], sizes = [2, 32], strides = [1, 1]} : vector<2x128xf32> to vector<2x32xf32>
    %70 = vector.extract_strided_slice %67 {offsets = [0, 64], sizes = [2, 32], strides = [1, 1]} : vector<2x128xf32> to vector<2x32xf32>
    %71 = vector.extract_strided_slice %66 {offsets = [0, 96], sizes = [2, 32], strides = [1, 1]} : vector<2x128xf32> to vector<2x32xf32>
    %72 = arith.mulf %69, %37 : vector<2x32xf32>
    %73 = arith.mulf %68, %70 : vector<2x32xf32>
    %74 = arith.addf %72, %73 : vector<2x32xf32>
    %75 = math.tanh %74 : vector<2x32xf32>
    %76 = arith.mulf %71, %75 : vector<2x32xf32>
    %77 = tpu.concatenate %76, %58 in 1 : vector<2x32xf32>, vector<2x32xf32> -> vector<2x64xf32>
    %cst_26 = arith.constant dense<0.000000e+00> : vector<2x128xf32>
    %78 = tpu.matmul %77, %16, %cst_26 {dimension_numbers = #tpu.dot_dimension_numbers<[1], [0], [0], [1], [0, 0, 1, 1], [], []>} : vector<2x64xf32>, vector<64x128xf32>, vector<2x128xf32> -> vector<2x128xf32>
    %79 = vector.broadcast %17 : vector<1x128xf32> to vector<2x128xf32>
    %80 = arith.addf %78, %79 : vector<2x128xf32>
    %81 = arith.negf %80 : vector<2x128xf32>
    %82 = math.exp %81 : vector<2x128xf32>
    %cst_27 = arith.constant 1.000000e+00 : f32
    %83 = vector.broadcast %cst_27 : f32 to vector<2x128xf32>
    %84 = arith.addf %83, %82 : vector<2x128xf32>
    %85 = arith.divf %83, %84 : vector<2x128xf32>
    %86 = math.tanh %80 : vector<2x128xf32>
    %87 = vector.extract_strided_slice %85 {offsets = [0, 0], sizes = [2, 32], strides = [1, 1]} : vector<2x128xf32> to vector<2x32xf32>
    %88 = vector.extract_strided_slice %85 {offsets = [0, 32], sizes = [2, 32], strides = [1, 1]} : vector<2x128xf32> to vector<2x32xf32>
    %89 = vector.extract_strided_slice %86 {offsets = [0, 64], sizes = [2, 32], strides = [1, 1]} : vector<2x128xf32> to vector<2x32xf32>
    %90 = vector.extract_strided_slice %85 {offsets = [0, 96], sizes = [2, 32], strides = [1, 1]} : vector<2x128xf32> to vector<2x32xf32>
    %91 = arith.mulf %88, %56 : vector<2x32xf32>
    %92 = arith.mulf %87, %89 : vector<2x32xf32>
    %93 = arith.addf %91, %92 : vector<2x32xf32>
    %94 = math.tanh %93 : vector<2x32xf32>
    %95 = arith.mulf %90, %94 : vector<2x32xf32>
    %96 = vector.extract_strided_slice %14 {offsets = [4, 0], sizes = [2, 128], strides = [1, 1]} : vector<16x128xf32> to vector<2x128xf32>
    %cst_28 = arith.constant dense<0.000000e+00> : vector<2x128xf32>
    %97 = tpu.matmul %76, %15, %cst_28 {dimension_numbers = #tpu.dot_dimension_numbers<[1], [0], [0], [1], [0, 0, 1, 1], [], []>} : vector<2x32xf32>, vector<32x128xf32>, vector<2x128xf32> -> vector<2x128xf32>
    %98 = arith.addf %96, %97 : vector<2x128xf32>
    %99 = arith.negf %98 : vector<2x128xf32>
    %100 = math.exp %99 : vector<2x128xf32>
    %cst_29 = arith.constant 1.000000e+00 : f32
    %101 = vector.broadcast %cst_29 : f32 to vector<2x128xf32>
    %102 = arith.addf %101, %100 : vector<2x128xf32>
    %103 = arith.divf %101, %102 : vector<2x128xf32>
    %104 = math.tanh %98 : vector<2x128xf32>
    %105 = vector.extract_strided_slice %103 {offsets = [0, 0], sizes = [2, 32], strides = [1, 1]} : vector<2x128xf32> to vector<2x32xf32>
    %106 = vector.extract_strided_slice %103 {offsets = [0, 32], sizes = [2, 32], strides = [1, 1]} : vector<2x128xf32> to vector<2x32xf32>
    %107 = vector.extract_strided_slice %104 {offsets = [0, 64], sizes = [2, 32], strides = [1, 1]} : vector<2x128xf32> to vector<2x32xf32>
    %108 = vector.extract_strided_slice %103 {offsets = [0, 96], sizes = [2, 32], strides = [1, 1]} : vector<2x128xf32> to vector<2x32xf32>
    %109 = arith.mulf %106, %74 : vector<2x32xf32>
    %110 = arith.mulf %105, %107 : vector<2x32xf32>
    %111 = arith.addf %109, %110 : vector<2x32xf32>
    %112 = math.tanh %111 : vector<2x32xf32>
    %113 = arith.mulf %108, %112 : vector<2x32xf32>
    %114 = tpu.concatenate %113, %95 in 1 : vector<2x32xf32>, vector<2x32xf32> -> vector<2x64xf32>
    %cst_30 = arith.constant dense<0.000000e+00> : vector<2x128xf32>
    %115 = tpu.matmul %114, %16, %cst_30 {dimension_numbers = #tpu.dot_dimension_numbers<[1], [0], [0], [1], [0, 0, 1, 1], [], []>} : vector<2x64xf32>, vector<64x128xf32>, vector<2x128xf32> -> vector<2x128xf32>
    %116 = vector.broadcast %17 : vector<1x128xf32> to vector<2x128xf32>
    %117 = arith.addf %115, %116 : vector<2x128xf32>
    %118 = arith.negf %117 : vector<2x128xf32>
    %119 = math.exp %118 : vector<2x128xf32>
    %cst_31 = arith.constant 1.000000e+00 : f32
    %120 = vector.broadcast %cst_31 : f32 to vector<2x128xf32>
    %121 = arith.addf %120, %119 : vector<2x128xf32>
    %122 = arith.divf %120, %121 : vector<2x128xf32>
    %123 = math.tanh %117 : vector<2x128xf32>
    %124 = vector.extract_strided_slice %122 {offsets = [0, 0], sizes = [2, 32], strides = [1, 1]} : vector<2x128xf32> to vector<2x32xf32>
    %125 = vector.extract_strided_slice %122 {offsets = [0, 32], sizes = [2, 32], strides = [1, 1]} : vector<2x128xf32> to vector<2x32xf32>
    %126 = vector.extract_strided_slice %123 {offsets = [0, 64], sizes = [2, 32], strides = [1, 1]} : vector<2x128xf32> to vector<2x32xf32>
    %127 = vector.extract_strided_slice %122 {offsets = [0, 96], sizes = [2, 32], strides = [1, 1]} : vector<2x128xf32> to vector<2x32xf32>
    %128 = arith.mulf %125, %93 : vector<2x32xf32>
    %129 = arith.mulf %124, %126 : vector<2x32xf32>
    %130 = arith.addf %128, %129 : vector<2x32xf32>
    %131 = math.tanh %130 : vector<2x32xf32>
    %132 = arith.mulf %127, %131 : vector<2x32xf32>
    %133 = vector.extract_strided_slice %14 {offsets = [6, 0], sizes = [2, 128], strides = [1, 1]} : vector<16x128xf32> to vector<2x128xf32>
    %cst_32 = arith.constant dense<0.000000e+00> : vector<2x128xf32>
    %134 = tpu.matmul %113, %15, %cst_32 {dimension_numbers = #tpu.dot_dimension_numbers<[1], [0], [0], [1], [0, 0, 1, 1], [], []>} : vector<2x32xf32>, vector<32x128xf32>, vector<2x128xf32> -> vector<2x128xf32>
    %135 = arith.addf %133, %134 : vector<2x128xf32>
    %136 = arith.negf %135 : vector<2x128xf32>
    %137 = math.exp %136 : vector<2x128xf32>
    %cst_33 = arith.constant 1.000000e+00 : f32
    %138 = vector.broadcast %cst_33 : f32 to vector<2x128xf32>
    %139 = arith.addf %138, %137 : vector<2x128xf32>
    %140 = arith.divf %138, %139 : vector<2x128xf32>
    %141 = math.tanh %135 : vector<2x128xf32>
    %142 = vector.extract_strided_slice %140 {offsets = [0, 0], sizes = [2, 32], strides = [1, 1]} : vector<2x128xf32> to vector<2x32xf32>
    %143 = vector.extract_strided_slice %140 {offsets = [0, 32], sizes = [2, 32], strides = [1, 1]} : vector<2x128xf32> to vector<2x32xf32>
    %144 = vector.extract_strided_slice %141 {offsets = [0, 64], sizes = [2, 32], strides = [1, 1]} : vector<2x128xf32> to vector<2x32xf32>
    %145 = vector.extract_strided_slice %140 {offsets = [0, 96], sizes = [2, 32], strides = [1, 1]} : vector<2x128xf32> to vector<2x32xf32>
    %146 = arith.mulf %143, %111 : vector<2x32xf32>
    %147 = arith.mulf %142, %144 : vector<2x32xf32>
    %148 = arith.addf %146, %147 : vector<2x32xf32>
    %149 = math.tanh %148 : vector<2x32xf32>
    %150 = arith.mulf %145, %149 : vector<2x32xf32>
    %151 = tpu.concatenate %150, %132 in 1 : vector<2x32xf32>, vector<2x32xf32> -> vector<2x64xf32>
    %cst_34 = arith.constant dense<0.000000e+00> : vector<2x128xf32>
    %152 = tpu.matmul %151, %16, %cst_34 {dimension_numbers = #tpu.dot_dimension_numbers<[1], [0], [0], [1], [0, 0, 1, 1], [], []>} : vector<2x64xf32>, vector<64x128xf32>, vector<2x128xf32> -> vector<2x128xf32>
    %153 = vector.broadcast %17 : vector<1x128xf32> to vector<2x128xf32>
    %154 = arith.addf %152, %153 : vector<2x128xf32>
    %155 = arith.negf %154 : vector<2x128xf32>
    %156 = math.exp %155 : vector<2x128xf32>
    %cst_35 = arith.constant 1.000000e+00 : f32
    %157 = vector.broadcast %cst_35 : f32 to vector<2x128xf32>
    %158 = arith.addf %157, %156 : vector<2x128xf32>
    %159 = arith.divf %157, %158 : vector<2x128xf32>
    %160 = math.tanh %154 : vector<2x128xf32>
    %161 = vector.extract_strided_slice %159 {offsets = [0, 0], sizes = [2, 32], strides = [1, 1]} : vector<2x128xf32> to vector<2x32xf32>
    %162 = vector.extract_strided_slice %159 {offsets = [0, 32], sizes = [2, 32], strides = [1, 1]} : vector<2x128xf32> to vector<2x32xf32>
    %163 = vector.extract_strided_slice %160 {offsets = [0, 64], sizes = [2, 32], strides = [1, 1]} : vector<2x128xf32> to vector<2x32xf32>
    %164 = vector.extract_strided_slice %159 {offsets = [0, 96], sizes = [2, 32], strides = [1, 1]} : vector<2x128xf32> to vector<2x32xf32>
    %165 = arith.mulf %162, %130 : vector<2x32xf32>
    %166 = arith.mulf %161, %163 : vector<2x32xf32>
    %167 = arith.addf %165, %166 : vector<2x32xf32>
    %168 = math.tanh %167 : vector<2x32xf32>
    %169 = arith.mulf %164, %168 : vector<2x32xf32>
    %170 = vector.extract_strided_slice %14 {offsets = [8, 0], sizes = [2, 128], strides = [1, 1]} : vector<16x128xf32> to vector<2x128xf32>
    %cst_36 = arith.constant dense<0.000000e+00> : vector<2x128xf32>
    %171 = tpu.matmul %150, %15, %cst_36 {dimension_numbers = #tpu.dot_dimension_numbers<[1], [0], [0], [1], [0, 0, 1, 1], [], []>} : vector<2x32xf32>, vector<32x128xf32>, vector<2x128xf32> -> vector<2x128xf32>
    %172 = arith.addf %170, %171 : vector<2x128xf32>
    %173 = arith.negf %172 : vector<2x128xf32>
    %174 = math.exp %173 : vector<2x128xf32>
    %cst_37 = arith.constant 1.000000e+00 : f32
    %175 = vector.broadcast %cst_37 : f32 to vector<2x128xf32>
    %176 = arith.addf %175, %174 : vector<2x128xf32>
    %177 = arith.divf %175, %176 : vector<2x128xf32>
    %178 = math.tanh %172 : vector<2x128xf32>
    %179 = vector.extract_strided_slice %177 {offsets = [0, 0], sizes = [2, 32], strides = [1, 1]} : vector<2x128xf32> to vector<2x32xf32>
    %180 = vector.extract_strided_slice %177 {offsets = [0, 32], sizes = [2, 32], strides = [1, 1]} : vector<2x128xf32> to vector<2x32xf32>
    %181 = vector.extract_strided_slice %178 {offsets = [0, 64], sizes = [2, 32], strides = [1, 1]} : vector<2x128xf32> to vector<2x32xf32>
    %182 = vector.extract_strided_slice %177 {offsets = [0, 96], sizes = [2, 32], strides = [1, 1]} : vector<2x128xf32> to vector<2x32xf32>
    %183 = arith.mulf %180, %148 : vector<2x32xf32>
    %184 = arith.mulf %179, %181 : vector<2x32xf32>
    %185 = arith.addf %183, %184 : vector<2x32xf32>
    %186 = math.tanh %185 : vector<2x32xf32>
    %187 = arith.mulf %182, %186 : vector<2x32xf32>
    %188 = tpu.concatenate %187, %169 in 1 : vector<2x32xf32>, vector<2x32xf32> -> vector<2x64xf32>
    %cst_38 = arith.constant dense<0.000000e+00> : vector<2x128xf32>
    %189 = tpu.matmul %188, %16, %cst_38 {dimension_numbers = #tpu.dot_dimension_numbers<[1], [0], [0], [1], [0, 0, 1, 1], [], []>} : vector<2x64xf32>, vector<64x128xf32>, vector<2x128xf32> -> vector<2x128xf32>
    %190 = vector.broadcast %17 : vector<1x128xf32> to vector<2x128xf32>
    %191 = arith.addf %189, %190 : vector<2x128xf32>
    %192 = arith.negf %191 : vector<2x128xf32>
    %193 = math.exp %192 : vector<2x128xf32>
    %cst_39 = arith.constant 1.000000e+00 : f32
    %194 = vector.broadcast %cst_39 : f32 to vector<2x128xf32>
    %195 = arith.addf %194, %193 : vector<2x128xf32>
    %196 = arith.divf %194, %195 : vector<2x128xf32>
    %197 = math.tanh %191 : vector<2x128xf32>
    %198 = vector.extract_strided_slice %196 {offsets = [0, 0], sizes = [2, 32], strides = [1, 1]} : vector<2x128xf32> to vector<2x32xf32>
    %199 = vector.extract_strided_slice %196 {offsets = [0, 32], sizes = [2, 32], strides = [1, 1]} : vector<2x128xf32> to vector<2x32xf32>
    %200 = vector.extract_strided_slice %197 {offsets = [0, 64], sizes = [2, 32], strides = [1, 1]} : vector<2x128xf32> to vector<2x32xf32>
    %201 = vector.extract_strided_slice %196 {offsets = [0, 96], sizes = [2, 32], strides = [1, 1]} : vector<2x128xf32> to vector<2x32xf32>
    %202 = arith.mulf %199, %167 : vector<2x32xf32>
    %203 = arith.mulf %198, %200 : vector<2x32xf32>
    %204 = arith.addf %202, %203 : vector<2x32xf32>
    %205 = math.tanh %204 : vector<2x32xf32>
    %206 = arith.mulf %201, %205 : vector<2x32xf32>
    %207 = vector.extract_strided_slice %14 {offsets = [10, 0], sizes = [2, 128], strides = [1, 1]} : vector<16x128xf32> to vector<2x128xf32>
    %cst_40 = arith.constant dense<0.000000e+00> : vector<2x128xf32>
    %208 = tpu.matmul %187, %15, %cst_40 {dimension_numbers = #tpu.dot_dimension_numbers<[1], [0], [0], [1], [0, 0, 1, 1], [], []>} : vector<2x32xf32>, vector<32x128xf32>, vector<2x128xf32> -> vector<2x128xf32>
    %209 = arith.addf %207, %208 : vector<2x128xf32>
    %210 = arith.negf %209 : vector<2x128xf32>
    %211 = math.exp %210 : vector<2x128xf32>
    %cst_41 = arith.constant 1.000000e+00 : f32
    %212 = vector.broadcast %cst_41 : f32 to vector<2x128xf32>
    %213 = arith.addf %212, %211 : vector<2x128xf32>
    %214 = arith.divf %212, %213 : vector<2x128xf32>
    %215 = math.tanh %209 : vector<2x128xf32>
    %216 = vector.extract_strided_slice %214 {offsets = [0, 0], sizes = [2, 32], strides = [1, 1]} : vector<2x128xf32> to vector<2x32xf32>
    %217 = vector.extract_strided_slice %214 {offsets = [0, 32], sizes = [2, 32], strides = [1, 1]} : vector<2x128xf32> to vector<2x32xf32>
    %218 = vector.extract_strided_slice %215 {offsets = [0, 64], sizes = [2, 32], strides = [1, 1]} : vector<2x128xf32> to vector<2x32xf32>
    %219 = vector.extract_strided_slice %214 {offsets = [0, 96], sizes = [2, 32], strides = [1, 1]} : vector<2x128xf32> to vector<2x32xf32>
    %220 = arith.mulf %217, %185 : vector<2x32xf32>
    %221 = arith.mulf %216, %218 : vector<2x32xf32>
    %222 = arith.addf %220, %221 : vector<2x32xf32>
    %223 = math.tanh %222 : vector<2x32xf32>
    %224 = arith.mulf %219, %223 : vector<2x32xf32>
    %225 = tpu.concatenate %224, %206 in 1 : vector<2x32xf32>, vector<2x32xf32> -> vector<2x64xf32>
    %cst_42 = arith.constant dense<0.000000e+00> : vector<2x128xf32>
    %226 = tpu.matmul %225, %16, %cst_42 {dimension_numbers = #tpu.dot_dimension_numbers<[1], [0], [0], [1], [0, 0, 1, 1], [], []>} : vector<2x64xf32>, vector<64x128xf32>, vector<2x128xf32> -> vector<2x128xf32>
    %227 = vector.broadcast %17 : vector<1x128xf32> to vector<2x128xf32>
    %228 = arith.addf %226, %227 : vector<2x128xf32>
    %229 = arith.negf %228 : vector<2x128xf32>
    %230 = math.exp %229 : vector<2x128xf32>
    %cst_43 = arith.constant 1.000000e+00 : f32
    %231 = vector.broadcast %cst_43 : f32 to vector<2x128xf32>
    %232 = arith.addf %231, %230 : vector<2x128xf32>
    %233 = arith.divf %231, %232 : vector<2x128xf32>
    %234 = math.tanh %228 : vector<2x128xf32>
    %235 = vector.extract_strided_slice %233 {offsets = [0, 0], sizes = [2, 32], strides = [1, 1]} : vector<2x128xf32> to vector<2x32xf32>
    %236 = vector.extract_strided_slice %233 {offsets = [0, 32], sizes = [2, 32], strides = [1, 1]} : vector<2x128xf32> to vector<2x32xf32>
    %237 = vector.extract_strided_slice %234 {offsets = [0, 64], sizes = [2, 32], strides = [1, 1]} : vector<2x128xf32> to vector<2x32xf32>
    %238 = vector.extract_strided_slice %233 {offsets = [0, 96], sizes = [2, 32], strides = [1, 1]} : vector<2x128xf32> to vector<2x32xf32>
    %239 = arith.mulf %236, %204 : vector<2x32xf32>
    %240 = arith.mulf %235, %237 : vector<2x32xf32>
    %241 = arith.addf %239, %240 : vector<2x32xf32>
    %242 = math.tanh %241 : vector<2x32xf32>
    %243 = arith.mulf %238, %242 : vector<2x32xf32>
    %244 = vector.extract_strided_slice %14 {offsets = [12, 0], sizes = [2, 128], strides = [1, 1]} : vector<16x128xf32> to vector<2x128xf32>
    %cst_44 = arith.constant dense<0.000000e+00> : vector<2x128xf32>
    %245 = tpu.matmul %224, %15, %cst_44 {dimension_numbers = #tpu.dot_dimension_numbers<[1], [0], [0], [1], [0, 0, 1, 1], [], []>} : vector<2x32xf32>, vector<32x128xf32>, vector<2x128xf32> -> vector<2x128xf32>
    %246 = arith.addf %244, %245 : vector<2x128xf32>
    %247 = arith.negf %246 : vector<2x128xf32>
    %248 = math.exp %247 : vector<2x128xf32>
    %cst_45 = arith.constant 1.000000e+00 : f32
    %249 = vector.broadcast %cst_45 : f32 to vector<2x128xf32>
    %250 = arith.addf %249, %248 : vector<2x128xf32>
    %251 = arith.divf %249, %250 : vector<2x128xf32>
    %252 = math.tanh %246 : vector<2x128xf32>
    %253 = vector.extract_strided_slice %251 {offsets = [0, 0], sizes = [2, 32], strides = [1, 1]} : vector<2x128xf32> to vector<2x32xf32>
    %254 = vector.extract_strided_slice %251 {offsets = [0, 32], sizes = [2, 32], strides = [1, 1]} : vector<2x128xf32> to vector<2x32xf32>
    %255 = vector.extract_strided_slice %252 {offsets = [0, 64], sizes = [2, 32], strides = [1, 1]} : vector<2x128xf32> to vector<2x32xf32>
    %256 = vector.extract_strided_slice %251 {offsets = [0, 96], sizes = [2, 32], strides = [1, 1]} : vector<2x128xf32> to vector<2x32xf32>
    %257 = arith.mulf %254, %222 : vector<2x32xf32>
    %258 = arith.mulf %253, %255 : vector<2x32xf32>
    %259 = arith.addf %257, %258 : vector<2x32xf32>
    %260 = math.tanh %259 : vector<2x32xf32>
    %261 = arith.mulf %256, %260 : vector<2x32xf32>
    %262 = tpu.concatenate %261, %243 in 1 : vector<2x32xf32>, vector<2x32xf32> -> vector<2x64xf32>
    %cst_46 = arith.constant dense<0.000000e+00> : vector<2x128xf32>
    %263 = tpu.matmul %262, %16, %cst_46 {dimension_numbers = #tpu.dot_dimension_numbers<[1], [0], [0], [1], [0, 0, 1, 1], [], []>} : vector<2x64xf32>, vector<64x128xf32>, vector<2x128xf32> -> vector<2x128xf32>
    %264 = vector.broadcast %17 : vector<1x128xf32> to vector<2x128xf32>
    %265 = arith.addf %263, %264 : vector<2x128xf32>
    %266 = arith.negf %265 : vector<2x128xf32>
    %267 = math.exp %266 : vector<2x128xf32>
    %cst_47 = arith.constant 1.000000e+00 : f32
    %268 = vector.broadcast %cst_47 : f32 to vector<2x128xf32>
    %269 = arith.addf %268, %267 : vector<2x128xf32>
    %270 = arith.divf %268, %269 : vector<2x128xf32>
    %271 = math.tanh %265 : vector<2x128xf32>
    %272 = vector.extract_strided_slice %270 {offsets = [0, 0], sizes = [2, 32], strides = [1, 1]} : vector<2x128xf32> to vector<2x32xf32>
    %273 = vector.extract_strided_slice %270 {offsets = [0, 32], sizes = [2, 32], strides = [1, 1]} : vector<2x128xf32> to vector<2x32xf32>
    %274 = vector.extract_strided_slice %271 {offsets = [0, 64], sizes = [2, 32], strides = [1, 1]} : vector<2x128xf32> to vector<2x32xf32>
    %275 = vector.extract_strided_slice %270 {offsets = [0, 96], sizes = [2, 32], strides = [1, 1]} : vector<2x128xf32> to vector<2x32xf32>
    %276 = arith.mulf %273, %241 : vector<2x32xf32>
    %277 = arith.mulf %272, %274 : vector<2x32xf32>
    %278 = arith.addf %276, %277 : vector<2x32xf32>
    %279 = math.tanh %278 : vector<2x32xf32>
    %280 = arith.mulf %275, %279 : vector<2x32xf32>
    %281 = vector.extract_strided_slice %14 {offsets = [14, 0], sizes = [2, 128], strides = [1, 1]} : vector<16x128xf32> to vector<2x128xf32>
    %cst_48 = arith.constant dense<0.000000e+00> : vector<2x128xf32>
    %282 = tpu.matmul %261, %15, %cst_48 {dimension_numbers = #tpu.dot_dimension_numbers<[1], [0], [0], [1], [0, 0, 1, 1], [], []>} : vector<2x32xf32>, vector<32x128xf32>, vector<2x128xf32> -> vector<2x128xf32>
    %283 = arith.addf %281, %282 : vector<2x128xf32>
    %284 = arith.negf %283 : vector<2x128xf32>
    %285 = math.exp %284 : vector<2x128xf32>
    %cst_49 = arith.constant 1.000000e+00 : f32
    %286 = vector.broadcast %cst_49 : f32 to vector<2x128xf32>
    %287 = arith.addf %286, %285 : vector<2x128xf32>
    %288 = arith.divf %286, %287 : vector<2x128xf32>
    %289 = math.tanh %283 : vector<2x128xf32>
    %290 = vector.extract_strided_slice %288 {offsets = [0, 0], sizes = [2, 32], strides = [1, 1]} : vector<2x128xf32> to vector<2x32xf32>
    %291 = vector.extract_strided_slice %288 {offsets = [0, 32], sizes = [2, 32], strides = [1, 1]} : vector<2x128xf32> to vector<2x32xf32>
    %292 = vector.extract_strided_slice %289 {offsets = [0, 64], sizes = [2, 32], strides = [1, 1]} : vector<2x128xf32> to vector<2x32xf32>
    %293 = vector.extract_strided_slice %288 {offsets = [0, 96], sizes = [2, 32], strides = [1, 1]} : vector<2x128xf32> to vector<2x32xf32>
    %294 = arith.mulf %291, %259 : vector<2x32xf32>
    %295 = arith.mulf %290, %292 : vector<2x32xf32>
    %296 = arith.addf %294, %295 : vector<2x32xf32>
    %297 = math.tanh %296 : vector<2x32xf32>
    %298 = arith.mulf %293, %297 : vector<2x32xf32>
    %299 = tpu.concatenate %298, %280 in 1 : vector<2x32xf32>, vector<2x32xf32> -> vector<2x64xf32>
    %cst_50 = arith.constant dense<0.000000e+00> : vector<2x128xf32>
    %300 = tpu.matmul %299, %16, %cst_50 {dimension_numbers = #tpu.dot_dimension_numbers<[1], [0], [0], [1], [0, 0, 1, 1], [], []>} : vector<2x64xf32>, vector<64x128xf32>, vector<2x128xf32> -> vector<2x128xf32>
    %301 = vector.broadcast %17 : vector<1x128xf32> to vector<2x128xf32>
    %302 = arith.addf %300, %301 : vector<2x128xf32>
    %303 = arith.negf %302 : vector<2x128xf32>
    %304 = math.exp %303 : vector<2x128xf32>
    %cst_51 = arith.constant 1.000000e+00 : f32
    %305 = vector.broadcast %cst_51 : f32 to vector<2x128xf32>
    %306 = arith.addf %305, %304 : vector<2x128xf32>
    %307 = arith.divf %305, %306 : vector<2x128xf32>
    %308 = math.tanh %302 : vector<2x128xf32>
    %309 = vector.extract_strided_slice %307 {offsets = [0, 0], sizes = [2, 32], strides = [1, 1]} : vector<2x128xf32> to vector<2x32xf32>
    %310 = vector.extract_strided_slice %307 {offsets = [0, 32], sizes = [2, 32], strides = [1, 1]} : vector<2x128xf32> to vector<2x32xf32>
    %311 = vector.extract_strided_slice %308 {offsets = [0, 64], sizes = [2, 32], strides = [1, 1]} : vector<2x128xf32> to vector<2x32xf32>
    %312 = vector.extract_strided_slice %307 {offsets = [0, 96], sizes = [2, 32], strides = [1, 1]} : vector<2x128xf32> to vector<2x32xf32>
    %313 = arith.mulf %310, %278 : vector<2x32xf32>
    %314 = arith.mulf %309, %311 : vector<2x32xf32>
    %315 = arith.addf %313, %314 : vector<2x32xf32>
    %316 = math.tanh %315 : vector<2x32xf32>
    %317 = arith.mulf %312, %316 : vector<2x32xf32>
    %318 = tpu.concatenate %298, %317 in 1 : vector<2x32xf32>, vector<2x32xf32> -> vector<2x64xf32>
    %c0_52 = arith.constant 0 : index
    %c0_53 = arith.constant 0 : index
    %319 = vector.load %arg8[%c0_52, %c0_53] : memref<1x64xf32, #tpu.memory_space<vmem>>, vector<1x64xf32>
    %320 = vector.broadcast %319 : vector<1x64xf32> to vector<2x64xf32>
    %321 = arith.mulf %318, %320 : vector<2x64xf32>
    %cst_54 = arith.constant dense<0.000000e+00> : vector<2xf32>
    %322 = vector.multi_reduction <add>, %321, %cst_54 [1] : vector<2x64xf32> to vector<2xf32>
    %323 = vector.shape_cast %322 : vector<2xf32> to vector<2x1xf32>
    %c0_55 = arith.constant 0 : index
    %c0_56 = arith.constant 0 : index
    %324 = vector.load %arg9[%c0_55, %c0_56] : memref<1x1xf32, #tpu.memory_space<vmem>>, vector<1x1xf32>
    %325 = vector.broadcast %324 : vector<1x1xf32> to vector<2x1xf32>
    %326 = arith.addf %323, %325 : vector<2x1xf32>
    %327 = vector.shape_cast %326 : vector<2x1xf32> to vector<2x1xf32>
    %328 = vector.broadcast %327 : vector<2x1xf32> to vector<2x128xf32>
    %c0_57 = arith.constant 0 : index
    %c0_58 = arith.constant 0 : index
    %329 = vector.load %arg10[%c0_57, %c0_58] : memref<2x128xf32, #tpu.memory_space<vmem>>, vector<2x128xf32>
    tpu.vector_store %arg10[%c0_57, %c0_58], %328 {strides = array<i32>} : memref<2x128xf32, #tpu.memory_space<vmem>>, vector<2x128xf32>,
    return
  }
}

</mosaic_0001>

<bundles_post_ra>
// kernel: tpu_custom_call.1
= control target key start
LH: loop header
LB: loop body
LE: loop exit
PB: predicated region body
PF: predicated region fallthrough
CT: control target
= control target key end

     0   :  { %s3258_s0 = inlined_call_operand.vmem [shape: f32[16,1], index: 0, kind: input, shape index: {}]   ;;  %s3259_s1 = inlined_call_operand.hbm [shape: f32[1,32], index: 1, kind: input, shape index: {}]   ;;  %s3260_s2 = inlined_call_operand.hbm [shape: f32[1,32], index: 2, kind: input, shape index: {}]   ;;  %s3261_s3 = inlined_call_operand.vmem [shape: f32[32,128], index: 3, kind: input, shape index: {}]   ;;  %s3262_s4 = inlined_call_operand.hbm [shape: f32[32,128], index: 4, kind: input, shape index: {}]   ;;  %s3263_s5 = inlined_call_operand.vmem [shape: f32[1,128], index: 5, kind: input, shape index: {}]   ;;  %s3264_s6 = inlined_call_operand.hbm [shape: f32[64,128], index: 6, kind: input, shape index: {}]   ;;  %s3265_s7 = inlined_call_operand.vmem [shape: f32[1,128], index: 7, kind: input, shape index: {}]   ;;  %s3266_s8 = inlined_call_operand.vmem [shape: f32[1,64], index: 8, kind: input, shape index: {}]   ;;  %s3267_s9 = inlined_call_operand.<no memory space> [shape: f32[1,1], index: 9, kind: input, shape index: {}]   ;;  %s3268_s10 = inlined_call_operand.hbm [shape: f32[2,128], index: 10, kind: output, shape index: {}]  }
   0x1   :  { %v15_v0 = vstv %s3267_s9 }
   0x2   :  { %16 = vst [vmem:[#allocation2] sm:$0x1] %v15_v0 }
   0x3   :  { %17 = vsyncpa [#allocation4], 0 }
   0x4   :  { %18 = vsyncpa [#allocation7], 0 }
   0x5   :  { %19 = vsyncpa [#allocation10], 0 }
   0x6   :  { %20 = vsyncpa [#allocation5], 0  ;;  %s2790_s15 = smov [#allocation6]   ;;  %s2791_s17 = smov [#allocation3]  }
   0x7   :  { %s39_s16 = sshll.u32 %s2790_s15, 4  ;;  %s29_s18 = sshll.u32 %s2791_s17, 4  ;;  %s40_s16 = int_to_ptr.vmem [resolvable:$true] %s39_s16  ;;  %s30_s18 = int_to_ptr.vmem [resolvable:$true] %s29_s18 }
   0x8   :  { %s2672_s21 = scalar_lea.hbm %s3260_s2, 16 }
   0x9   :  { %p2673_p0 = scmp.ne.s32.totalorder %s3260_s2, %s2672_s21  ;;  %p2676_p1 = scmp.lt.u32.totalorder %s2672_s21, %s3260_s2 }
   0xb   :  { %p2678_p2 = pnand %p2676_p1, %p2673_p0 }
   0xd   :  { %2681 = shalt.err (!%p2678_p2)
}
   0xe   :  { %s2682_s25 = scalar_lea.vmem %s40_s16, 16  ;;  %s2686_s26 = scalar_lea.vmem %s40_s16, 32 }
   0xf   :  { %p2683_p3 = scmp.ne.s32.totalorder %s40_s16, %s2682_s25  ;;  %p2687_p4 = scmp.lt.s32.totalorder %s40_s16, %s40_s16 }
  0x10   :  { %p2688_p5 = scmp.lt.s32.totalorder %s2686_s26, %s2682_s25 }
  0x12   :  { %p2689_p6 = por %p2688_p5, %p2687_p4 }
  0x14   :  { %p2690_p7 = pnand %p2689_p6, %p2683_p3 }
  0x16   :  { %2693 = shalt.err (!%p2690_p7)
}
  0x17   :  { %42 = dma.hbm_to_vmem [thread:$0]  %s3260_s2, 16, %s40_s16, [#allocation7]  }
  0x18   :  { %s2694_s11 = scalar_lea.hbm %s3259_s1, 16 }
  0x19   :  { %p2695_p8 = scmp.ne.s32.totalorder %s3259_s1, %s2694_s11  ;;  %p2698_p9 = scmp.lt.u32.totalorder %s2694_s11, %s3259_s1 }
  0x1b   :  { %p2700_p10 = pnand %p2698_p9, %p2695_p8 }
  0x1d   :  { %2703 = shalt.err (!%p2700_p10)
}
  0x1e   :  { %s2704_s17 = scalar_lea.vmem %s30_s18, 16  ;;  %s2708_s19 = scalar_lea.vmem %s30_s18, 32 }
  0x1f   :  { %p2705_p11 = scmp.ne.s32.totalorder %s30_s18, %s2704_s17  ;;  %p2709_p12 = scmp.lt.s32.totalorder %s30_s18, %s30_s18 }
  0x20   :  { %p2710_p13 = scmp.lt.s32.totalorder %s2708_s19, %s2704_s17 }
  0x22   :  { %p2711_p0 = por %p2710_p13, %p2709_p12 }
  0x24   :  { %p2712_p1 = pnand %p2711_p0, %p2705_p11 }
  0x26   :  { %2715 = shalt.err (!%p2712_p1)
}
  0x27   :  { %32 = dma.hbm_to_vmem [thread:$0]  %s3259_s1, 16, %s30_s18, [#allocation4]  }
  0x28   :  { %s2792_s20 = smov [#allocation8]   ;;  %s2716_s9 = scalar_lea.hbm %s3262_s4, 512 }
  0x29   :  { %s50_s21 = sshll.u32 %s2792_s20, 4  ;;  %p2717_p2 = scmp.ne.s32.totalorder %s3262_s4, %s2716_s9  ;;  %s51_s21 = int_to_ptr.vmem [resolvable:$true] %s50_s21 }
  0x2a   :  { %p2720_p3 = scmp.lt.u32.totalorder %s2716_s9, %s3262_s4 }
  0x2c   :  { %p2722_p4 = pnand %p2720_p3, %p2717_p2 }
  0x2e   :  { %2725 = shalt.err (!%p2722_p4)
}
  0x2f   :  { %s2726_s28 = scalar_lea.vmem %s51_s21, 512  ;;  %p2731_p6 = scmp.lt.s32.totalorder %s51_s21, %s51_s21 }
  0x30   :  { %p2727_p5 = scmp.ne.s32.totalorder %s51_s21, %s2726_s28  ;;  %p2732_p7 = scmp.lt.s32.totalorder %s2726_s28, %s2726_s28 }
  0x32   :  { %p2733_p8 = por %p2732_p7, %p2731_p6 }
  0x34   :  { %p2734_p9 = pnand %p2733_p8, %p2727_p5 }
  0x36   :  { %2737 = shalt.err (!%p2734_p9)
}
  0x37   :  { %s2793_s1 = smov 128   ;;  %s2794_s18 = smov 8  }
  0x38   :  { %56 = dma.hbm_to_vmem [thread:$0]  %s3262_s4, 512, %s51_s21, [#allocation7], %s2793_s1, %s2793_s1, %s2794_s18  }
  0x39   :  { %s2795_s11 = smov [#allocation9]   ;;  %s2738_s15 = scalar_lea.hbm %s3264_s6, 1024 }
  0x3a   :  { %s64_s12 = sshll.u32 %s2795_s11, 4  ;;  %p2739_p10 = scmp.ne.s32.totalorder %s3264_s6, %s2738_s15  ;;  %s65_s12 = int_to_ptr.vmem [resolvable:$true] %s64_s12 }
  0x3b   :  { %p2742_p11 = scmp.lt.u32.totalorder %s2738_s15, %s3264_s6 }
  0x3d   :  { %p2744_p12 = pnand %p2742_p11, %p2739_p10 }
  0x3f   :  { %2747 = shalt.err (!%p2744_p12)
}
  0x40   :  { %s2748_s20 = scalar_lea.vmem %s65_s12, 1024  ;;  %p2753_p0 = scmp.lt.s32.totalorder %s65_s12, %s65_s12 }
  0x41   :  { %p2749_p13 = scmp.ne.s32.totalorder %s65_s12, %s2748_s20  ;;  %p2754_p1 = scmp.lt.s32.totalorder %s2748_s20, %s2748_s20 }
  0x43   :  { %p2755_p2 = por %p2754_p1, %p2753_p0 }
  0x45   :  { %p2756_p3 = pnand %p2755_p2, %p2749_p13 }
  0x47   :  { %2759 = shalt.err (!%p2756_p3)
}
  0x48   :  { %70 = dma.hbm_to_vmem [thread:$0]  %s3264_s6, 1024, %s65_s12, [#allocation10], %s2793_s1, %s2793_s1, %s2794_s18  }
  0x49   :  { %2782 = dma.done.wait [#allocation4], 16  }
  0x4a   :  { %2783 = vsyncadd [#allocation4], 4294967280 }
  0x4b   :  { %2784 = dma.done.wait [#allocation7], 528  }
  0x4c   :  { %2785 = vsyncadd [#allocation7], 4294966768 }
  0x4d   :  { %2786 = dma.done.wait [#allocation10], 1024  }
  0x4e   :  { %2787 = vsyncadd [#allocation10], 4294966272  ;;  %v2796_v1 = vmov 0   ;;  %v89_v2 = vld [vmem:[%s3258_s0] sm:$0xff]  ;;  %v122_v4 = vld [vmem:[%s3261_s3 + $0x8] sm:$0xff]  ;;  %v2797_v13 = vmov 0.0|0.0  }
  0x4f   :  { %2543 = vset.pattern.permute.xlu0 %v2796_v1  ;;  %v121_v3 = vld [vmem:[%s3261_s3] sm:$0xff]  ;;  %v90_v5 = vld [vmem:[%s3258_s0 + $0x8] sm:$0xff]  ;;  %v123_v10 = vld [vmem:[%s3261_s3 + $0x10] sm:$0xff]  ;;  %2386 = vmatprep.subr.bf16.mxu1 %v2797_v13  ;;  %vm2798_vm0 = vmmov 0   ;;  %v2799_v17 = vmov 0.0   ;;  %vm132_vm1 = vcmask 261120  }
  0x50   :  { %94 = vperm.xlu0 %2543, %v89_v2   ;;  %v2378_v6 = vpack.c.bf16 %v122_v4, %v121_v3  ;;  %v214_v7 = vld [vmem:[#allocation8] sm:$0xff]  ;;  %v215_v8 = vld [vmem:[#allocation8 + $0x8] sm:$0xff]  ;;  %v124_v11 = vld [vmem:[%s3261_s3 + $0x18] sm:$0xff]  ;;  %2146 = vmatprep.mubr.msk.f32.mxu1 %vm2798_vm0, %v2799_v17  ;;  %s2800_s30 = smov 64   ;;  %vm336_vm2 = vcmask 523264   ;;  %vm1935_vm3 = vcmask 523270  }
  0x51   :  { %v2921_v9 = vpack.c.bf16 %v215_v8, %v214_v7  ;;  %v2382_v12 = vpack.c.bf16 %v124_v11, %v123_v10  ;;  %v216_v14 = vld [vmem:[#allocation8 + $0x10] sm:$0xff]  ;;  %v217_v15 = vld [vmem:[#allocation8 + $0x18] sm:$0xff]  ;;  %v218_v46 = vld [vmem:[#allocation9] sm:$0xff]  ;;  %s2802_s14 = smov [#allocation11]  }
  0x52   :  { %2379 = vmatprep.subr.bf16.mxu0 %v2378_v6  ;;  %v2932_v16 = vpack.c.bf16 %v217_v15, %v216_v14  ;;  %v1970_v18 = vld [vmem:[#allocation3] ss:$0 sm:$0xff]  ;;  %v1971_v20 = vld [vmem:[#allocation6] ss:$0 sm:$0xff]  ;;  %v1972_v30 = vld [vmem:[%s3263_s5] ss:$0 sm:$0xff] }
  0x53   :  { %2381 = vmatpush3.bf16.msra.mxu0 %v2378_v6  ;;  %2388 = vmatpush3.bf16.msra.mxu1 %v2921_v9  ;;  %s2801_s5 = smov 32   ;;  %v219_v47 = vld [vmem:[#allocation9 + $0x8] sm:$0xff]  ;;  %v220_v48 = vld [vmem:[#allocation9 + $0x10] sm:$0xff]  ;;  %v221_v50 = vld [vmem:[#allocation9 + $0x18] sm:$0xff]  ;;  %s1959_s15 = sshll.u32 %s2802_s14, 4  ;;  %s1960_s15 = int_to_ptr.vmem [resolvable:$true] %s1959_s15 }
  0x54   :  { %99 = vperm.xlu0 %2543, %v90_v5   ;;  %2383 = vmatprep.subr.bf16.mxu0 %v2382_v12  ;;  %v2963_v49 = vpack.c.bf16 %v219_v47, %v218_v46  ;;  %v2966_v51 = vpack.c.bf16 %v221_v50, %v220_v48  ;;  %v222_v52 = vld [vmem:[#allocation9 + $0x20] sm:$0xff]  ;;  %v223_v53 = vld [vmem:[#allocation9 + $0x28] sm:$0xff]  ;;  %v224_v55 = vld [vmem:[#allocation9 + $0x30] sm:$0xff]  ;;  %s2760_s17 = scalar_lea.vmem %s1960_s15, 32  ;;  %p2765_p5 = scmp.lt.s32.totalorder %s1960_s15, %s1960_s15 }
  0x55   :  { %2389 = vmatprep.subr.bf16.mxu1 %v2797_v13  ;;  %v2970_v54 = vpack.c.bf16 %v223_v53, %v222_v52  ;;  %v225_v56 = vld [vmem:[#allocation9 + $0x38] sm:$0xff]  ;;  %p2761_p4 = scmp.ne.s32.totalorder %s1960_s15, %s2760_s17  ;;  %p2766_p6 = scmp.lt.s32.totalorder %s2760_s17, %s2760_s17 }
  0x56   :  { %v2975_v58 = vpack.c.bf16 %v225_v56, %v224_v55  ;;  %v3003_v63 = vld [vmem:[%s3265_s7] ss:$0 sm:$0xff] }
  0x57   :  { %2385 = vmatpush3.bf16.msra.mxu0 %v2382_v12  ;;  %2391 = vmatpush3.bf16.msra.mxu1 %v2932_v16  ;;  %p2767_p7 = por %p2766_p6, %p2765_p5 }
  0x58   :  { %2392 = vmatprep.subr.bf16.mxu0 %v2797_v13  ;;  %2404 = vmatprep.subr.bf16.mxu1 %v2797_v13 }
  0x59   :  { %p2768_p8 = pnand %p2767_p7, %p2761_p4 }
  0x5a   :  { %2147 = vmatmul.mubr.f32.vlgmr.msra.gmra.mrb[0].mxu1 %v2799_v17 }
  0x5b   :  { %2406 = vmatpush3.bf16.msra.mxu1 %v2921_v9  ;;  %2176 = vmatprep.mubr.msk.f32.mxu1 %vm2798_vm0, %v2799_v17 }
  0x5c   :  { %2407 = vmatprep.subr.bf16.mxu1 %v2797_v13 }
  0x5f   :  { %2409 = vmatpush3.bf16.msra.mxu1 %v2932_v16 }
  0x60   :  { %2410 = vmatprep.subr.bf16.mxu1 %v2797_v13 }
  0xcf   :  { %v95_v19 = vpop.permute.xlu0 %94 }
  0xd0   :  { %v108_v21 = vmul.f32 %v1970_v18, %v95_v19 }
  0xd2   :  { %v117_v22 = vadd.f32 %v1971_v20, %v108_v21 }
  0xd3   :  { %v100_v23 = vpop.permute.xlu0 %99 }
  0xd4   :  { %v109_v24 = vmul.f32 %v1970_v18, %v100_v23  ;;  %v119_v25 = vmax.f32 %v117_v22, 0.0 }
  0xd6   :  { %v118_v26 = vadd.f32 %v1971_v20, %v109_v24  ;;  %2135 = vmatprep.mubr.msk.f32.mxu0 %vm132_vm1, %v119_v25 }
  0xd8   :  { %v120_v27 = vmax.f32 %v118_v26, 0.0 }
  0xda   :  { %2136 = vmatmul.mubr.msk.f32.vlgmr.msra.gmra.mrb[0].mxu0 %vm132_vm1, %v120_v27 }
  0xdb   :  { %2165 = vmatprep.mubr.msk.f32.mxu0 %vm2798_vm0, %v2799_v17  ;;  %2394 = vmatpush3.bf16.msra.mxu0 %v2963_v49 }
  0xdc   :  { %2395 = vmatprep.subr.bf16.mxu0 %v2797_v13 }
  0xdf   :  { %2397 = vmatpush3.bf16.msra.mxu0 %v2966_v51 }
  0xe0   :  { %2398 = vmatprep.subr.bf16.mxu0 %v2797_v13 }
  0xe3   :  { %2400 = vmatpush3.bf16.msra.mxu0 %v2970_v54 }
  0xe4   :  { %2401 = vmatprep.subr.bf16.mxu0 %v2797_v13 }
  0xe7   :  { %2403 = vmatpush3.bf16.msra.mxu0 %v2975_v58 }
  0xe8   :  { %2422 = vmatprep.subr.bf16.mxu0 %v2797_v13 }
 0x12d   :  { %v296_v28 = vpop.f32.mrb[0].mxu1 }
 0x12e   :  { %v2148_v29 = vpop.f32.mrb[1].mxu1 }
 0x1ad   :  { %v2137_v31 = vpop.f32.mrb[0].mxu0 }
 0x1ae   :  { %v2953_v32 = vadd.f32 %v2137_v31, %v1972_v30  ;;  %v205_v33 = vpop.f32.mrb[1].mxu0 }
 0x1af   :  { %v2955_v34 = vadd.f32 %v1972_v30, %v205_v33 }
 0x1b1   :  { %v300_v35 = vadd.f32 %v296_v28, %v2955_v34 }
 0x1b3   :  { %2544 = vtanh.f32 %v300_v35  ;;  %v1975_v37 = vmul.f32 -1.442695, %v300_v35 }
 0x1b5   :  { %2546 = vpow2.f32 %v1975_v37 }
 0x1bd   :  { %v2545_v36 = vpop.eup %2544 }
 0x1be   :  { %310 = vrot.lane.b32.xlu1 %v2545_v36, %s2800_s30 }
 0x1bf   :  { %v2547_v38 = vpop.eup %2546 }
 0x1c0   :  { %v304_v39 = vadd.f32 1.0, %v2547_v38 }
 0x1c2   :  { %2548 = vrcp.f32 %v304_v39 }
 0x1cc   :  { %v2549_v40 = vpop.eup %2548 }
 0x1cd   :  { %v308_v43 = vmul.f32 0.0, %v2549_v40 }
 0x230   :  { %v311_v41 = vpop.permute.xlu1 %310 }
 0x231   :  { %v313_v42 = vmul.f32 %v2549_v40, %v311_v41 }
 0x233   :  { %315 = vrot.lane.b32.xlu1 %v313_v42, %s2801_s5 }
 0x2a5   :  { %v316_v44 = vpop.permute.xlu1 %315 }
 0x2a6   :  { %v2960_v45 = vadd.f32 %v316_v44, %v308_v43 }
 0x2a8   :  { %2550 = vtanh.f32 %v2960_v45  ;;  %v518_v25 = vrot.slane %v2960_v45, 6 }
 0x2b2   :  { %v2551_v57 = vpop.eup %2550 }
 0x2b3   :  { %321 = vrot.lane.b32.xlu0 %v2551_v57, %s2800_s30 }
 0x325   :  { %v322_v59 = vpop.permute.xlu0 %321 }
 0x326   :  { %v324_v60 = vmul.f32 %v2549_v40, %v322_v59 }
 0x328   :  { %326 = vrot.lane.b32.xlu1 %v324_v60, %s2801_s5 }
 0x39a   :  { %v327_v61 = vpop.permute.xlu1 %326 }
 0x39b   :  { %v329_v62 = vsel %vm132_vm1, %v327_v61, 0.0  ;;  %2177 = vmatmul.mubr.msk.f32.vlgmr.msra.gmra.mrb[2].mxu1 %vm132_vm1, %v327_v61 }
 0x39c   :  { %2166 = vmatmul.mubr.msk.f32.vlgmr.msra.gmra.mrb[2].mxu0 %vm336_vm2, %v329_v62  ;;  %2412 = vmatpush3.bf16.msra.mxu1 %v2963_v49 }
 0x39d   :  { %2413 = vmatprep.subr.bf16.mxu1 %v2797_v13  ;;  %2424 = vmatpush3.bf16.msra.mxu0 %v2921_v9 }
 0x39e   :  { %2425 = vmatprep.subr.bf16.mxu0 %v2797_v13  ;;  %2195 = vmatprep.mubr.msk.f32.mxu1 %vm2798_vm0, %v2799_v17 }
 0x39f   :  { %2206 = vmatprep.mubr.msk.f32.mxu0 %vm2798_vm0, %v2799_v17 }
 0x3a0   :  { %2415 = vmatpush3.bf16.msra.mxu1 %v2966_v51 }
 0x3a1   :  { %2416 = vmatprep.subr.bf16.mxu1 %v2797_v13  ;;  %2427 = vmatpush3.bf16.msra.mxu0 %v2932_v16 }
 0x3a2   :  { %2428 = vmatprep.subr.bf16.mxu0 %v2797_v13 }
 0x3a4   :  { %2418 = vmatpush3.bf16.msra.mxu1 %v2970_v54 }
 0x3a5   :  { %2419 = vmatprep.subr.bf16.mxu1 %v2797_v13 }
 0x3a8   :  { %2421 = vmatpush3.bf16.msra.mxu1 %v2975_v58 }
 0x3a9   :  { %2440 = vmatprep.subr.bf16.mxu1 %v2797_v13 }
 0x46e   :  { %v502_v0 = vpop.f32.mrb[2].mxu1 }
 0x46f   :  { %v507_v1 = vrot.slane %v502_v0, 6  ;;  %v406_v2 = vpop.f32.mrb[2].mxu0  ;;  %v2178_v3 = vpop.f32.mrb[3].mxu1 }
 0x470   :  { %v407_v4 = vadd.f32 %v3003_v63, %v406_v2  ;;  %v2167_v5 = vpop.f32.mrb[3].mxu0 }
 0x471   :  { %v509_v6 = vadd.f32 %v507_v1, %v2955_v34 }
 0x472   :  { %2552 = vtanh.f32 %v407_v4  ;;  %v1978_v10 = vmul.f32 -1.442695, %v407_v4 }
 0x473   :  { %2554 = vtanh.f32 %v509_v6  ;;  %v1980_v11 = vmul.f32 -1.442695, %v509_v6 }
 0x474   :  { %2556 = vpow2.f32 %v1978_v10 }
 0x475   :  { %2558 = vpow2.f32 %v1980_v11 }
 0x47c   :  { %v2553_v7 = vpop.eup %2552 }
 0x47d   :  { %v2555_v8 = vpop.eup %2554  ;;  %419 = vrot.lane.b32.xlu0 %v2553_v7, %s2800_s30 }
 0x47e   :  { %522 = vrot.lane.b32.xlu1 %v2555_v8, %s2800_s30  ;;  %v2557_v12 = vpop.eup %2556 }
 0x47f   :  { %v2559_v14 = vpop.eup %2558  ;;  %v413_v15 = vadd.f32 1.0, %v2557_v12 }
 0x480   :  { %v513_v18 = vadd.f32 1.0, %v2559_v14 }
 0x481   :  { %2560 = vrcp.f32 %v413_v15 }
 0x482   :  { %2562 = vrcp.f32 %v513_v18 }
 0x48b   :  { %v2561_v19 = vpop.eup %2560 }
 0x48c   :  { %v2563_v21 = vpop.eup %2562  ;;  %v417_v26 = vmul.f32 0.0, %v2561_v19 }
 0x48d   :  { %v520_v28 = vmul.f32 %v2563_v21, %v518_v25 }
 0x4ef   :  { %v420_v20 = vpop.permute.xlu0 %419 }
 0x4f0   :  { %v422_v22 = vmul.f32 %v2561_v19, %v420_v20  ;;  %v523_v23 = vpop.permute.xlu1 %522 }
 0x4f1   :  { %v525_v24 = vmul.f32 %v2563_v21, %v523_v23 }
 0x4f2   :  { %424 = vrot.lane.b32.xlu0 %v422_v22, %s2801_s5 }
 0x4f3   :  { %527 = vrot.lane.b32.xlu1 %v525_v24, %s2801_s5 }
 0x564   :  { %v425_v27 = vpop.permute.xlu0 %424 }
 0x565   :  { %v3012_v29 = vadd.f32 %v425_v27, %v417_v26  ;;  %v528_v30 = vpop.permute.xlu1 %527 }
 0x566   :  { %v3014_v31 = vadd.f32 %v528_v30, %v520_v28 }
 0x567   :  { %2564 = vtanh.f32 %v3012_v29 }
 0x568   :  { %2566 = vtanh.f32 %v3014_v31  ;;  %v732_v11 = vrot.slane %v3014_v31, 6 }
 0x571   :  { %v2565_v33 = vpop.eup %2564 }
 0x572   :  { %v2567_v35 = vpop.eup %2566  ;;  %430 = vrot.lane.b32.xlu0 %v2565_v33, %s2800_s30 }
 0x573   :  { %533 = vrot.lane.b32.xlu1 %v2567_v35, %s2800_s30 }
 0x5e4   :  { %v431_v36 = vpop.permute.xlu0 %430 }
 0x5e5   :  { %v433_v37 = vmul.f32 %v2561_v19, %v431_v36  ;;  %v534_v38 = vpop.permute.xlu1 %533 }
 0x5e6   :  { %v536_v39 = vmul.f32 %v2563_v21, %v534_v38 }
 0x5e7   :  { %v542_v40 = vrot.slane %v433_v37, 6 }
 0x5e8   :  { %538 = vrot.lane.b32.xlu0 %v536_v39, %s2801_s5  ;;  %v645_v41 = vrot.slane %v536_v39, 2 }
 0x5e9   :  { %543 = vrot.lane.b32.xlu1 %v542_v40, %s2800_s30 }
 0x5ec   :  { %646 = vrot.lane.b32.xlu0 %v645_v41, %s2801_s5 }
 0x65a   :  { %v539_v42 = vpop.permute.xlu0 %538 }
 0x65b   :  { %v544_v43 = vpop.permute.xlu1 %543 }
 0x65c   :  { %v546_v44 = vsel %vm132_vm1, %v539_v42, %v544_v43 }
 0x65d   :  { %v548_v45 = vrot.slane %v546_v44, 2 }
 0x65e   :  { %v647_v46 = vpop.permute.xlu0 %646 }
 0x65f   :  { %2196 = vmatmul.mubr.msk.f32.vlgmr.msra.gmra.mrb[4].mxu1 %vm336_vm2, %v548_v45  ;;  %2207 = vmatmul.mubr.msk.f32.vlgmr.msra.gmra.mrb[4].mxu0 %vm132_vm1, %v647_v46 }
 0x660   :  { %2430 = vmatpush3.bf16.msra.mxu0 %v2963_v49  ;;  %2442 = vmatpush3.bf16.msra.mxu1 %v2921_v9 }
 0x661   :  { %2431 = vmatprep.subr.bf16.mxu0 %v2797_v13  ;;  %2443 = vmatprep.subr.bf16.mxu1 %v2797_v13 }
 0x662   :  { %2225 = vmatprep.mubr.msk.f32.mxu0 %vm2798_vm0, %v2799_v17  ;;  %2236 = vmatprep.mubr.msk.f32.mxu1 %vm2798_vm0, %v2799_v17 }
 0x664   :  { %2433 = vmatpush3.bf16.msra.mxu0 %v2966_v51  ;;  %2445 = vmatpush3.bf16.msra.mxu1 %v2932_v16 }
 0x665   :  { %2434 = vmatprep.subr.bf16.mxu0 %v2797_v13  ;;  %2446 = vmatprep.subr.bf16.mxu1 %v2797_v13 }
 0x668   :  { %2436 = vmatpush3.bf16.msra.mxu0 %v2970_v54 }
 0x669   :  { %2437 = vmatprep.subr.bf16.mxu0 %v2797_v13 }
 0x66c   :  { %2439 = vmatpush3.bf16.msra.mxu0 %v2975_v58 }
 0x66d   :  { %2458 = vmatprep.subr.bf16.mxu0 %v2797_v13 }
 0x732   :  { %v617_v47 = vpop.f32.mrb[4].mxu1  ;;  %v716_v48 = vpop.f32.mrb[4].mxu0 }
 0x733   :  { %v618_v50 = vadd.f32 %v3003_v63, %v617_v47  ;;  %v721_v52 = vrot.slane %v716_v48, 4  ;;  %v2197_v53 = vpop.f32.mrb[5].mxu1  ;;  %v2208_v55 = vpop.f32.mrb[5].mxu0 }
 0x735   :  { %2568 = vtanh.f32 %v618_v50  ;;  %v723_v56 = vadd.f32 %v721_v52, %v2955_v34  ;;  %v1982_v60 = vmul.f32 -1.442695, %v618_v50 }
 0x737   :  { %2570 = vtanh.f32 %v723_v56  ;;  %v1984_v61 = vmul.f32 -1.442695, %v723_v56 }
 0x738   :  { %2572 = vpow2.f32 %v1982_v60 }
 0x739   :  { %2574 = vpow2.f32 %v1984_v61 }
 0x73f   :  { %v2569_v57 = vpop.eup %2568 }
 0x740   :  { %630 = vrot.lane.b32.xlu1 %v2569_v57, %s2800_s30 }
 0x741   :  { %v2571_v59 = vpop.eup %2570 }
 0x742   :  { %736 = vrot.lane.b32.xlu0 %v2571_v59, %s2800_s30  ;;  %v2573_v62 = vpop.eup %2572 }
 0x743   :  { %v2575_v0 = vpop.eup %2574  ;;  %v624_v1 = vadd.f32 1.0, %v2573_v62 }
 0x744   :  { %v727_v2 = vadd.f32 1.0, %v2575_v0 }
 0x745   :  { %2576 = vrcp.f32 %v624_v1 }
 0x746   :  { %2578 = vrcp.f32 %v727_v2 }
 0x74f   :  { %v2577_v3 = vpop.eup %2576 }
 0x750   :  { %v2579_v6 = vpop.eup %2578  ;;  %v628_v10 = vmul.f32 %v2577_v3, %v3012_v29 }
 0x751   :  { %v734_v15 = vmul.f32 %v2579_v6, %v732_v11 }
 0x7b2   :  { %v631_v4 = vpop.permute.xlu1 %630 }
 0x7b3   :  { %v633_v5 = vmul.f32 %v2577_v3, %v631_v4 }
 0x7b4   :  { %v737_v7 = vpop.permute.xlu0 %736 }
 0x7b5   :  { %635 = vrot.lane.b32.xlu1 %v633_v5, %s2801_s5  ;;  %v739_v8 = vmul.f32 %v2579_v6, %v737_v7 }
 0x7b7   :  { %741 = vrot.lane.b32.xlu0 %v739_v8, %s2801_s5 }
 0x827   :  { %v636_v12 = vpop.permute.xlu1 %635 }
 0x828   :  { %v3050_v14 = vadd.f32 %v636_v12, %v628_v10 }
 0x829   :  { %v742_v18 = vpop.permute.xlu0 %741 }
 0x82a   :  { %2580 = vtanh.f32 %v3050_v14  ;;  %v3053_v19 = vadd.f32 %v742_v18, %v734_v15 }
 0x82c   :  { %2582 = vtanh.f32 %v3053_v19  ;;  %v946_v60 = vrot.slane %v3053_v19, 6 }
 0x834   :  { %v2581_v20 = vpop.eup %2580 }
 0x835   :  { %641 = vrot.lane.b32.xlu1 %v2581_v20, %s2800_s30 }
 0x836   :  { %v2583_v21 = vpop.eup %2582 }
 0x837   :  { %747 = vrot.lane.b32.xlu0 %v2583_v21, %s2800_s30 }
 0x8a7   :  { %v642_v22 = vpop.permute.xlu1 %641 }
 0x8a8   :  { %v644_v23 = vmul.f32 %v2577_v3, %v642_v22 }
 0x8a9   :  { %v748_v25 = vpop.permute.xlu0 %747 }
 0x8aa   :  { %v756_v24 = vrot.slane %v644_v23, 4  ;;  %v750_v26 = vmul.f32 %v2579_v6, %v748_v25 }
 0x8ac   :  { %757 = vrot.lane.b32.xlu0 %v756_v24, %s2800_s30  ;;  %752 = vrot.lane.b32.xlu1 %v750_v26, %s2801_s5  ;;  %v859_v27 = vrot.slane %v750_v26, 4 }
 0x8b0   :  { %860 = vrot.lane.b32.xlu1 %v859_v27, %s2801_s5 }
 0x91e   :  { %v758_v28 = vpop.permute.xlu0 %757  ;;  %v753_v29 = vpop.permute.xlu1 %752 }
 0x91f   :  { %v760_v30 = vsel %vm132_vm1, %v753_v29, %v758_v28 }
 0x920   :  { %v762_v31 = vrot.slane %v760_v30, 4 }
 0x922   :  { %v861_v33 = vpop.permute.xlu1 %860  ;;  %2226 = vmatmul.mubr.msk.f32.vlgmr.msra.gmra.mrb[6].mxu0 %vm336_vm2, %v762_v31 }
 0x923   :  { %2237 = vmatmul.mubr.msk.f32.vlgmr.msra.gmra.mrb[6].mxu1 %vm132_vm1, %v861_v33  ;;  %2460 = vmatpush3.bf16.msra.mxu0 %v2921_v9 }
 0x924   :  { %2448 = vmatpush3.bf16.msra.mxu1 %v2963_v49  ;;  %2461 = vmatprep.subr.bf16.mxu0 %v2797_v13 }
 0x925   :  { %2449 = vmatprep.subr.bf16.mxu1 %v2797_v13  ;;  %2255 = vmatprep.mubr.msk.f32.mxu1 %vm2798_vm0, %v2799_v17 }
 0x926   :  { %2266 = vmatprep.mubr.msk.f32.mxu0 %vm2798_vm0, %v2799_v17 }
 0x927   :  { %2463 = vmatpush3.bf16.msra.mxu0 %v2932_v16 }
 0x928   :  { %2451 = vmatpush3.bf16.msra.mxu1 %v2966_v51  ;;  %2464 = vmatprep.subr.bf16.mxu0 %v2797_v13 }
 0x929   :  { %2452 = vmatprep.subr.bf16.mxu1 %v2797_v13 }
 0x92c   :  { %2454 = vmatpush3.bf16.msra.mxu1 %v2970_v54 }
 0x92d   :  { %2455 = vmatprep.subr.bf16.mxu1 %v2797_v13 }
 0x930   :  { %2457 = vmatpush3.bf16.msra.mxu1 %v2975_v58 }
 0x931   :  { %2476 = vmatprep.subr.bf16.mxu1 %v2797_v13 }
 0x9f5   :  { %v831_v35 = vpop.f32.mrb[6].mxu0 }
 0x9f6   :  { %v832_v36 = vadd.f32 %v3003_v63, %v831_v35  ;;  %v2227_v37 = vpop.f32.mrb[7].mxu0  ;;  %v930_v38 = vpop.f32.mrb[6].mxu1 }
 0x9f7   :  { %v935_v39 = vrot.slane %v930_v38, 2  ;;  %v2238_v40 = vpop.f32.mrb[7].mxu1 }
 0x9f8   :  { %2584 = vtanh.f32 %v832_v36  ;;  %v1986_v44 = vmul.f32 -1.442695, %v832_v36 }
 0x9f9   :  { %v937_v41 = vadd.f32 %v935_v39, %v2955_v34 }
 0x9fb   :  { %2586 = vtanh.f32 %v937_v41  ;;  %v1988_v45 = vmul.f32 -1.442695, %v937_v41 }
 0x9fc   :  { %2588 = vpow2.f32 %v1986_v44 }
 0x9fd   :  { %2590 = vpow2.f32 %v1988_v45 }
 0xa02   :  { %v2585_v42 = vpop.eup %2584 }
 0xa03   :  { %844 = vrot.lane.b32.xlu0 %v2585_v42, %s2800_s30 }
 0xa05   :  { %v2587_v43 = vpop.eup %2586 }
 0xa06   :  { %950 = vrot.lane.b32.xlu1 %v2587_v43, %s2800_s30  ;;  %v2589_v46 = vpop.eup %2588 }
 0xa07   :  { %v2591_v47 = vpop.eup %2590  ;;  %v838_v48 = vadd.f32 1.0, %v2589_v46 }
 0xa08   :  { %v941_v50 = vadd.f32 1.0, %v2591_v47 }
 0xa09   :  { %2592 = vrcp.f32 %v838_v48 }
 0xa0a   :  { %2594 = vrcp.f32 %v941_v50 }
 0xa13   :  { %v2593_v52 = vpop.eup %2592 }
 0xa14   :  { %v2595_v55 = vpop.eup %2594  ;;  %v842_v59 = vmul.f32 %v2593_v52, %v3050_v14 }
 0xa15   :  { %v948_v0 = vmul.f32 %v2595_v55, %v946_v60 }
 0xa75   :  { %v845_v53 = vpop.permute.xlu0 %844 }
 0xa76   :  { %v847_v34 = vmul.f32 %v2593_v52, %v845_v53 }
 0xa78   :  { %v951_v56 = vpop.permute.xlu1 %950  ;;  %849 = vrot.lane.b32.xlu0 %v847_v34, %s2801_s5 }
 0xa79   :  { %v953_v57 = vmul.f32 %v2595_v55, %v951_v56 }
 0xa7b   :  { %955 = vrot.lane.b32.xlu1 %v953_v57, %s2801_s5 }
 0xaea   :  { %v850_v61 = vpop.permute.xlu0 %849 }
 0xaeb   :  { %v3088_v62 = vadd.f32 %v850_v61, %v842_v59 }
 0xaed   :  { %2596 = vtanh.f32 %v3088_v62  ;;  %v956_v1 = vpop.permute.xlu1 %955 }
 0xaee   :  { %v3091_v2 = vadd.f32 %v956_v1, %v948_v0 }
 0xaf0   :  { %2598 = vtanh.f32 %v3091_v2  ;;  %v1157_v42 = vrot.slane %v3091_v2, 6 }
 0xaf7   :  { %v2597_v3 = vpop.eup %2596 }
 0xaf8   :  { %855 = vrot.lane.b32.xlu0 %v2597_v3, %s2800_s30 }
 0xafa   :  { %v2599_v4 = vpop.eup %2598 }
 0xafb   :  { %961 = vrot.lane.b32.xlu1 %v2599_v4, %s2800_s30 }
 0xb6a   :  { %v856_v5 = vpop.permute.xlu0 %855 }
 0xb6b   :  { %v858_v6 = vmul.f32 %v2593_v52, %v856_v5 }
 0xb6d   :  { %v970_v7 = vrot.slane %v858_v6, 2  ;;  %v962_v8 = vpop.permute.xlu1 %961 }
 0xb6e   :  { %v964_v10 = vmul.f32 %v2595_v55, %v962_v8 }
 0xb6f   :  { %971 = vrot.lane.b32.xlu1 %v970_v7, %s2800_s30 }
 0xb70   :  { %966 = vrot.lane.b32.xlu0 %v964_v10, %s2801_s5  ;;  %v1073_v11 = vrot.slane %v964_v10, 6 }
 0xb74   :  { %1074 = vrot.lane.b32.xlu0 %v1073_v11, %s2801_s5 }
 0xbe1   :  { %v972_v12 = vpop.permute.xlu1 %971 }
 0xbe2   :  { %v967_v14 = vpop.permute.xlu0 %966 }
 0xbe3   :  { %v974_v15 = vsel %vm132_vm1, %v967_v14, %v972_v12 }
 0xbe4   :  { %v976_v18 = vrot.slane %v974_v15, 6 }
 0xbe6   :  { %2256 = vmatmul.mubr.msk.f32.vlgmr.msra.gmra.mrb[8].mxu1 %vm336_vm2, %v976_v18  ;;  %v1075_v19 = vpop.permute.xlu0 %1074 }
 0xbe7   :  { %2267 = vmatmul.mubr.msk.f32.vlgmr.msra.gmra.mrb[8].mxu0 %vm132_vm1, %v1075_v19  ;;  %2478 = vmatpush3.bf16.msra.mxu1 %v2921_v9 }
 0xbe8   :  { %2466 = vmatpush3.bf16.msra.mxu0 %v2963_v49  ;;  %2479 = vmatprep.subr.bf16.mxu1 %v2797_v13 }
 0xbe9   :  { %2467 = vmatprep.subr.bf16.mxu0 %v2797_v13  ;;  %2296 = vmatprep.mubr.msk.f32.mxu1 %vm2798_vm0, %v2799_v17 }
 0xbea   :  { %2285 = vmatprep.mubr.msk.f32.mxu0 %vm2798_vm0, %v2799_v17 }
 0xbeb   :  { %2481 = vmatpush3.bf16.msra.mxu1 %v2932_v16 }
 0xbec   :  { %2469 = vmatpush3.bf16.msra.mxu0 %v2966_v51  ;;  %2482 = vmatprep.subr.bf16.mxu1 %v2797_v13 }
 0xbed   :  { %2470 = vmatprep.subr.bf16.mxu0 %v2797_v13 }
 0xbf0   :  { %2472 = vmatpush3.bf16.msra.mxu0 %v2970_v54 }
 0xbf1   :  { %2473 = vmatprep.subr.bf16.mxu0 %v2797_v13 }
 0xbf4   :  { %2475 = vmatpush3.bf16.msra.mxu0 %v2975_v58 }
 0xbf5   :  { %2494 = vmatprep.subr.bf16.mxu0 %v2797_v13 }
 0xcb9   :  { %v1045_v20 = vpop.f32.mrb[8].mxu1 }
 0xcba   :  { %v1046_v21 = vadd.f32 %v3003_v63, %v1045_v20  ;;  %v2257_v22 = vpop.f32.mrb[9].mxu1  ;;  %v1144_v23 = vpop.f32.mrb[8].mxu0 }
 0xcbb   :  { %v1148_v24 = vadd.f32 %v1144_v23, %v2953_v32  ;;  %v2268_v25 = vpop.f32.mrb[9].mxu0 }
 0xcbc   :  { %2600 = vtanh.f32 %v1046_v21  ;;  %v1990_v28 = vmul.f32 -1.442695, %v1046_v21 }
 0xcbd   :  { %2602 = vtanh.f32 %v1148_v24  ;;  %v1992_v29 = vmul.f32 -1.442695, %v1148_v24 }
 0xcbe   :  { %2604 = vpow2.f32 %v1990_v28 }
 0xcbf   :  { %2606 = vpow2.f32 %v1992_v29 }
 0xcc6   :  { %v2601_v26 = vpop.eup %2600 }
 0xcc7   :  { %v2603_v27 = vpop.eup %2602  ;;  %1058 = vrot.lane.b32.xlu1 %v2601_v26, %s2800_s30 }
 0xcc8   :  { %1161 = vrot.lane.b32.xlu0 %v2603_v27, %s2800_s30  ;;  %v2605_v30 = vpop.eup %2604 }
 0xcc9   :  { %v2607_v31 = vpop.eup %2606  ;;  %v1052_v33 = vadd.f32 1.0, %v2605_v30 }
 0xcca   :  { %v1152_v35 = vadd.f32 1.0, %v2607_v31 }
 0xccb   :  { %2608 = vrcp.f32 %v1052_v33 }
 0xccc   :  { %2610 = vrcp.f32 %v1152_v35 }
 0xcd5   :  { %v2609_v36 = vpop.eup %2608 }
 0xcd6   :  { %v2611_v38 = vpop.eup %2610  ;;  %v1056_v43 = vmul.f32 %v2609_v36, %v3088_v62 }
 0xcd7   :  { %v1159_v45 = vmul.f32 %v2611_v38, %v1157_v42 }
 0xd39   :  { %v1059_v37 = vpop.permute.xlu1 %1058 }
 0xd3a   :  { %v1061_v39 = vmul.f32 %v2609_v36, %v1059_v37  ;;  %v1162_v40 = vpop.permute.xlu0 %1161 }
 0xd3b   :  { %v1164_v41 = vmul.f32 %v2611_v38, %v1162_v40 }
 0xd3c   :  { %1063 = vrot.lane.b32.xlu1 %v1061_v39, %s2801_s5 }
 0xd3d   :  { %1166 = vrot.lane.b32.xlu0 %v1164_v41, %s2801_s5 }
 0xdae   :  { %v1064_v44 = vpop.permute.xlu1 %1063 }
 0xdaf   :  { %v3126_v46 = vadd.f32 %v1064_v44, %v1056_v43  ;;  %v1167_v47 = vpop.permute.xlu0 %1166 }
 0xdb0   :  { %v3128_v48 = vadd.f32 %v1167_v47, %v1159_v45 }
 0xdb1   :  { %2612 = vtanh.f32 %v3126_v46 }
 0xdb2   :  { %2614 = vtanh.f32 %v3128_v48  ;;  %v1366_v23 = vrot.slane %v3128_v48, 6 }
 0xdbb   :  { %v2613_v50 = vpop.eup %2612 }
 0xdbc   :  { %v2615_v52 = vpop.eup %2614  ;;  %1069 = vrot.lane.b32.xlu1 %v2613_v50, %s2800_s30 }
 0xdbd   :  { %1172 = vrot.lane.b32.xlu0 %v2615_v52, %s2800_s30 }
 0xe2e   :  { %v1070_v53 = vpop.permute.xlu1 %1069 }
 0xe2f   :  { %v1072_v34 = vmul.f32 %v2609_v36, %v1070_v53  ;;  %v1173_v55 = vpop.permute.xlu0 %1172 }
 0xe30   :  { %v1175_v56 = vmul.f32 %v2611_v38, %v1173_v55 }
 0xe31   :  { %1181 = vrot.lane.b32.xlu0 %v1072_v34, %s2800_s30 }
 0xe32   :  { %1177 = vrot.lane.b32.xlu1 %v1175_v56, %s2801_s5 }
 0xea3   :  { %v1182_v57 = vpop.permute.xlu0 %1181 }
 0xea4   :  { %v1178_v59 = vpop.permute.xlu1 %1177 }
 0xea5   :  { %v1184_v60 = vsel %vm132_vm1, %v1178_v59, %v1182_v57  ;;  %2297 = vmatmul.mubr.msk.f32.vlgmr.msra.gmra.mrb[10].mxu1 %vm132_vm1, %v1178_v59 }
 0xea6   :  { %2286 = vmatmul.mubr.msk.f32.vlgmr.msra.gmra.mrb[10].mxu0 %vm336_vm2, %v1184_v60  ;;  %2484 = vmatpush3.bf16.msra.mxu1 %v2963_v49 }
 0xea7   :  { %2485 = vmatprep.subr.bf16.mxu1 %v2797_v13  ;;  %2496 = vmatpush3.bf16.msra.mxu0 %v2921_v9 }
 0xea8   :  { %2497 = vmatprep.subr.bf16.mxu0 %v2797_v13  ;;  %2315 = vmatprep.mubr.msk.f32.mxu1 %vm2798_vm0, %v2799_v17 }
 0xea9   :  { %2326 = vmatprep.mubr.msk.f32.mxu0 %vm2798_vm0, %v2799_v17 }
 0xeaa   :  { %2487 = vmatpush3.bf16.msra.mxu1 %v2966_v51 }
 0xeab   :  { %2488 = vmatprep.subr.bf16.mxu1 %v2797_v13  ;;  %2499 = vmatpush3.bf16.msra.mxu0 %v2932_v16 }
 0xeac   :  { %2500 = vmatprep.subr.bf16.mxu0 %v2797_v13 }
 0xeae   :  { %2490 = vmatpush3.bf16.msra.mxu1 %v2970_v54 }
 0xeaf   :  { %2491 = vmatprep.subr.bf16.mxu1 %v2797_v13 }
 0xeb2   :  { %2493 = vmatpush3.bf16.msra.mxu1 %v2975_v58 }
 0xeb3   :  { %2512 = vmatprep.subr.bf16.mxu1 %v2797_v13 }
 0xf78   :  { %v1350_v61 = vpop.f32.mrb[10].mxu1 }
 0xf79   :  { %v1355_v62 = vrot.slane %v1350_v61, 6  ;;  %v1254_v0 = vpop.f32.mrb[10].mxu0  ;;  %v2298_v1 = vpop.f32.mrb[11].mxu1 }
 0xf7a   :  { %v1255_v2 = vadd.f32 %v3003_v63, %v1254_v0  ;;  %v2287_v3 = vpop.f32.mrb[11].mxu0 }
 0xf7b   :  { %v1357_v4 = vadd.f32 %v1355_v62, %v2953_v32 }
 0xf7c   :  { %2616 = vtanh.f32 %v1255_v2  ;;  %v1994_v7 = vmul.f32 -1.442695, %v1255_v2 }
 0xf7d   :  { %2618 = vtanh.f32 %v1357_v4  ;;  %v1996_v8 = vmul.f32 -1.442695, %v1357_v4 }
 0xf7e   :  { %2620 = vpow2.f32 %v1994_v7 }
 0xf7f   :  { %2622 = vpow2.f32 %v1996_v8 }
 0xf86   :  { %v2617_v5 = vpop.eup %2616 }
 0xf87   :  { %v2619_v6 = vpop.eup %2618  ;;  %1267 = vrot.lane.b32.xlu1 %v2617_v5, %s2800_s30 }
 0xf88   :  { %1370 = vrot.lane.b32.xlu0 %v2619_v6, %s2800_s30  ;;  %v2621_v10 = vpop.eup %2620 }
 0xf89   :  { %v2623_v11 = vpop.eup %2622  ;;  %v1261_v12 = vadd.f32 1.0, %v2621_v10 }
 0xf8a   :  { %v1361_v14 = vadd.f32 1.0, %v2623_v11 }
 0xf8b   :  { %2624 = vrcp.f32 %v1261_v12 }
 0xf8c   :  { %2626 = vrcp.f32 %v1361_v14 }
 0xf95   :  { %v2625_v15 = vpop.eup %2624 }
 0xf96   :  { %v2627_v19 = vpop.eup %2626  ;;  %v1265_v24 = vmul.f32 %v2625_v15, %v3126_v46 }
 0xf97   :  { %v1368_v26 = vmul.f32 %v2627_v19, %v1366_v23 }
 0xff9   :  { %v1268_v18 = vpop.permute.xlu1 %1267 }
 0xffa   :  { %v1270_v20 = vmul.f32 %v2625_v15, %v1268_v18  ;;  %v1371_v21 = vpop.permute.xlu0 %1370 }
 0xffb   :  { %v1373_v22 = vmul.f32 %v2627_v19, %v1371_v21 }
 0xffc   :  { %1272 = vrot.lane.b32.xlu1 %v1270_v20, %s2801_s5 }
 0xffd   :  { %1375 = vrot.lane.b32.xlu0 %v1373_v22, %s2801_s5 }
0x106e   :  { %v1273_v25 = vpop.permute.xlu1 %1272 }
0x106f   :  { %v3163_v27 = vadd.f32 %v1273_v25, %v1265_v24  ;;  %v1376_v28 = vpop.permute.xlu0 %1375 }
0x1070   :  { %v3165_v29 = vadd.f32 %v1376_v28, %v1368_v26 }
0x1071   :  { %2628 = vtanh.f32 %v3163_v27 }
0x1072   :  { %2630 = vtanh.f32 %v3165_v29  ;;  %v1580_v5 = vrot.slane %v3165_v29, 6 }
0x107b   :  { %v2629_v30 = vpop.eup %2628 }
0x107c   :  { %v2631_v31 = vpop.eup %2630  ;;  %1278 = vrot.lane.b32.xlu1 %v2629_v30, %s2800_s30 }
0x107d   :  { %1381 = vrot.lane.b32.xlu0 %v2631_v31, %s2800_s30 }
0x10ee   :  { %v1279_v33 = vpop.permute.xlu1 %1278 }
0x10ef   :  { %v1281_v35 = vmul.f32 %v2625_v15, %v1279_v33  ;;  %v1382_v36 = vpop.permute.xlu0 %1381 }
0x10f0   :  { %v1384_v37 = vmul.f32 %v2627_v19, %v1382_v36 }
0x10f1   :  { %v1390_v38 = vrot.slane %v1281_v35, 6 }
0x10f2   :  { %1386 = vrot.lane.b32.xlu1 %v1384_v37, %s2801_s5  ;;  %v1493_v39 = vrot.slane %v1384_v37, 2 }
0x10f3   :  { %1391 = vrot.lane.b32.xlu0 %v1390_v38, %s2800_s30 }
0x10f6   :  { %1494 = vrot.lane.b32.xlu1 %v1493_v39, %s2801_s5 }
0x1164   :  { %v1387_v40 = vpop.permute.xlu1 %1386 }
0x1165   :  { %v1392_v41 = vpop.permute.xlu0 %1391 }
0x1166   :  { %v1394_v42 = vsel %vm132_vm1, %v1387_v40, %v1392_v41 }
0x1167   :  { %v1396_v43 = vrot.slane %v1394_v42, 2 }
0x1168   :  { %v1495_v44 = vpop.permute.xlu1 %1494 }
0x1169   :  { %2316 = vmatmul.mubr.msk.f32.vlgmr.msra.gmra.mrb[12].mxu1 %vm336_vm2, %v1396_v43  ;;  %2327 = vmatmul.mubr.msk.f32.vlgmr.msra.gmra.mrb[12].mxu0 %vm132_vm1, %v1495_v44 }
0x116a   :  { %2502 = vmatpush3.bf16.msra.mxu0 %v2963_v49  ;;  %2514 = vmatpush3.bf16.msra.mxu1 %v2921_v9 }
0x116b   :  { %2503 = vmatprep.subr.bf16.mxu0 %v2797_v13  ;;  %2515 = vmatprep.subr.bf16.mxu1 %v2797_v13 }
0x116c   :  { %2345 = vmatprep.mubr.msk.f32.mxu0 %vm2798_vm0, %v2799_v17  ;;  %2356 = vmatprep.mubr.msk.f32.mxu1 %vm2798_vm0, %v2799_v17 }
0x116e   :  { %2505 = vmatpush3.bf16.msra.mxu0 %v2966_v51  ;;  %2517 = vmatpush3.bf16.msra.mxu1 %v2932_v16 }
0x116f   :  { %2506 = vmatprep.subr.bf16.mxu0 %v2797_v13  ;;  %2518 = vmatprep.subr.bf16.mxu1 %v2797_v13 }
0x1172   :  { %2508 = vmatpush3.bf16.msra.mxu0 %v2970_v54 }
0x1173   :  { %2509 = vmatprep.subr.bf16.mxu0 %v2797_v13 }
0x1176   :  { %2511 = vmatpush3.bf16.msra.mxu0 %v2975_v58 }
0x123c   :  { %v1465_v9 = vpop.f32.mrb[12].mxu1  ;;  %v1564_v45 = vpop.f32.mrb[12].mxu0 }
0x123d   :  { %v1466_v46 = vadd.f32 %v3003_v63, %v1465_v9  ;;  %v1569_v47 = vrot.slane %v1564_v45, 4  ;;  %v2317_v48 = vpop.f32.mrb[13].mxu1  ;;  %v2328_v50 = vpop.f32.mrb[13].mxu0 }
0x123f   :  { %2632 = vtanh.f32 %v1466_v46  ;;  %v1571_v16 = vadd.f32 %v1569_v47, %v2953_v32  ;;  %v1998_v34 = vmul.f32 -1.442695, %v1466_v46 }
0x1241   :  { %2634 = vtanh.f32 %v1571_v16  ;;  %v2000_v55 = vmul.f32 -1.442695, %v1571_v16 }
0x1242   :  { %2636 = vpow2.f32 %v1998_v34 }
0x1243   :  { %2638 = vpow2.f32 %v2000_v55 }
0x1249   :  { %v2633_v52 = vpop.eup %2632 }
0x124a   :  { %1478 = vrot.lane.b32.xlu0 %v2633_v52, %s2800_s30 }
0x124b   :  { %v2635_v53 = vpop.eup %2634 }
0x124c   :  { %1584 = vrot.lane.b32.xlu1 %v2635_v53, %s2800_s30  ;;  %v2637_v56 = vpop.eup %2636 }
0x124d   :  { %v2639_v57 = vpop.eup %2638  ;;  %v1472_v59 = vadd.f32 1.0, %v2637_v56 }
0x124e   :  { %v1575_v60 = vadd.f32 1.0, %v2639_v57 }
0x124f   :  { %2640 = vrcp.f32 %v1472_v59 }
0x1250   :  { %2642 = vrcp.f32 %v1575_v60 }
0x1259   :  { %v2641_v61 = vpop.eup %2640 }
0x125a   :  { %v2643_v1 = vpop.eup %2642  ;;  %v1476_v4 = vmul.f32 %v2641_v61, %v3163_v27 }
0x125b   :  { %v1582_v8 = vmul.f32 %v2643_v1, %v1580_v5 }
0x12bc   :  { %v1479_v62 = vpop.permute.xlu0 %1478 }
0x12bd   :  { %v1481_v0 = vmul.f32 %v2641_v61, %v1479_v62 }
0x12be   :  { %v1585_v2 = vpop.permute.xlu1 %1584 }
0x12bf   :  { %1483 = vrot.lane.b32.xlu0 %v1481_v0, %s2801_s5  ;;  %v1587_v3 = vmul.f32 %v2643_v1, %v1585_v2 }
0x12c1   :  { %1589 = vrot.lane.b32.xlu1 %v1587_v3, %s2801_s5 }
0x1331   :  { %v1484_v6 = vpop.permute.xlu0 %1483 }
0x1332   :  { %v3200_v7 = vadd.f32 %v1484_v6, %v1476_v4 }
0x1333   :  { %v1590_v10 = vpop.permute.xlu1 %1589 }
0x1334   :  { %2644 = vtanh.f32 %v3200_v7  ;;  %v3203_v11 = vadd.f32 %v1590_v10, %v1582_v8 }
0x1336   :  { %2646 = vtanh.f32 %v3203_v11  ;;  %v1794_v9 = vrot.slane %v3203_v11, 6 }
0x133e   :  { %v2645_v12 = vpop.eup %2644 }
0x133f   :  { %1489 = vrot.lane.b32.xlu0 %v2645_v12, %s2800_s30 }
0x1340   :  { %v2647_v14 = vpop.eup %2646 }
0x1341   :  { %1595 = vrot.lane.b32.xlu1 %v2647_v14, %s2800_s30 }
0x13b1   :  { %v1490_v15 = vpop.permute.xlu0 %1489 }
0x13b2   :  { %v1492_v18 = vmul.f32 %v2641_v61, %v1490_v15 }
0x13b3   :  { %v1596_v20 = vpop.permute.xlu1 %1595 }
0x13b4   :  { %v1604_v19 = vrot.slane %v1492_v18, 4  ;;  %v1598_v21 = vmul.f32 %v2643_v1, %v1596_v20  ;;  %v2007_v20 = vld [vmem:[%s3266_s8] ss:$0 sm:$0xff] }
0x13b6   :  { %1605 = vrot.lane.b32.xlu1 %v1604_v19, %s2800_s30  ;;  %1600 = vrot.lane.b32.xlu0 %v1598_v21, %s2801_s5  ;;  %v1707_v22 = vrot.slane %v1598_v21, 4 }
0x13ba   :  { %1708 = vrot.lane.b32.xlu0 %v1707_v22, %s2801_s5 }
0x1428   :  { %v1606_v23 = vpop.permute.xlu1 %1605  ;;  %v1601_v24 = vpop.permute.xlu0 %1600 }
0x1429   :  { %v1608_v25 = vsel %vm132_vm1, %v1601_v24, %v1606_v23 }
0x142a   :  { %v1610_v26 = vrot.slane %v1608_v25, 4  ;;  %v2008_v25 = vld [vmem:[#allocation2] ss:$0 sm:$0xff] }
0x142c   :  { %v1709_v27 = vpop.permute.xlu0 %1708  ;;  %2346 = vmatmul.mubr.msk.f32.vlgmr.msra.gmra.mrb[14].mxu0 %vm336_vm2, %v1610_v26 }
0x142d   :  { %2357 = vmatmul.mubr.msk.f32.vlgmr.msra.gmra.mrb[14].mxu1 %vm132_vm1, %v1709_v27 }
0x142e   :  { %2520 = vmatpush3.bf16.msra.mxu1 %v2963_v49  ;;  %2375 = vmatprep.mubr.msk.f32.mxu1 %vm2798_vm0, %v2799_v17 }
0x142f   :  { %2521 = vmatprep.subr.bf16.mxu1 %v2797_v13 }
0x1432   :  { %2523 = vmatpush3.bf16.msra.mxu1 %v2966_v51 }
0x1433   :  { %2524 = vmatprep.subr.bf16.mxu1 %v2797_v13 }
0x1436   :  { %2526 = vmatpush3.bf16.msra.mxu1 %v2970_v54 }
0x1437   :  { %2527 = vmatprep.subr.bf16.mxu1 %v2797_v13 }
0x143a   :  { %2529 = vmatpush3.bf16.msra.mxu1 %v2975_v58 }
0x14ff   :  { %v1679_v28 = vpop.f32.mrb[14].mxu0 }
0x1500   :  { %v1680_v29 = vadd.f32 %v3003_v63, %v1679_v28  ;;  %v2347_v30 = vpop.f32.mrb[15].mxu0  ;;  %v1778_v49 = vpop.f32.mrb[14].mxu1 }
0x1501   :  { %v1783_v31 = vrot.slane %v1778_v49, 2  ;;  %v2358_v33 = vpop.f32.mrb[15].mxu1 }
0x1502   :  { %2648 = vtanh.f32 %v1680_v29  ;;  %v2002_v13 = vmul.f32 -1.442695, %v1680_v29 }
0x1503   :  { %v1785_v17 = vadd.f32 %v1783_v31, %v2953_v32 }
0x1505   :  { %2650 = vtanh.f32 %v1785_v17  ;;  %v2004_v54 = vmul.f32 -1.442695, %v1785_v17 }
0x1506   :  { %2652 = vpow2.f32 %v2002_v13 }
0x1507   :  { %2654 = vpow2.f32 %v2004_v54 }
0x150c   :  { %v2649_v51 = vpop.eup %2648 }
0x150d   :  { %1692 = vrot.lane.b32.xlu1 %v2649_v51, %s2800_s30 }
0x150f   :  { %v2651_v35 = vpop.eup %2650 }
0x1510   :  { %1798 = vrot.lane.b32.xlu0 %v2651_v35, %s2800_s30  ;;  %v2653_v58 = vpop.eup %2652 }
0x1511   :  { %v2655_v36 = vpop.eup %2654  ;;  %v1686_v37 = vadd.f32 1.0, %v2653_v58 }
0x1512   :  { %v1789_v38 = vadd.f32 1.0, %v2655_v36 }
0x1513   :  { %2656 = vrcp.f32 %v1686_v37 }
0x1514   :  { %2658 = vrcp.f32 %v1789_v38 }
0x151d   :  { %v2657_v39 = vpop.eup %2656 }
0x151e   :  { %v2659_v41 = vpop.eup %2658  ;;  %v1690_v44 = vmul.f32 %v2657_v39, %v3200_v7 }
0x151f   :  { %v1796_v47 = vmul.f32 %v2659_v41, %v1794_v9 }
0x157f   :  { %v1693_v40 = vpop.permute.xlu1 %1692 }
0x1580   :  { %v1695_v32 = vmul.f32 %v2657_v39, %v1693_v40 }
0x1582   :  { %v1799_v42 = vpop.permute.xlu0 %1798  ;;  %1697 = vrot.lane.b32.xlu1 %v1695_v32, %s2801_s5 }
0x1583   :  { %v1801_v43 = vmul.f32 %v2659_v41, %v1799_v42 }
0x1585   :  { %1803 = vrot.lane.b32.xlu0 %v1801_v43, %s2801_s5 }
0x15f4   :  { %v1698_v45 = vpop.permute.xlu1 %1697 }
0x15f5   :  { %v1700_v46 = vadd.f32 %v1698_v45, %v1690_v44 }
0x15f7   :  { %2660 = vtanh.f32 %v1700_v46  ;;  %v1804_v48 = vpop.permute.xlu0 %1803 }
0x15f8   :  { %v1806_v50 = vadd.f32 %v1804_v48, %v1796_v47 }
0x15fa   :  { %2662 = vtanh.f32 %v1806_v50 }
0x1601   :  { %v2661_v16 = vpop.eup %2660 }
0x1602   :  { %1703 = vrot.lane.b32.xlu1 %v2661_v16, %s2800_s30 }
0x1604   :  { %v2663_v52 = vpop.eup %2662 }
0x1605   :  { %1809 = vrot.lane.b32.xlu0 %v2663_v52, %s2800_s30 }
0x1674   :  { %v1704_v53 = vpop.permute.xlu1 %1703 }
0x1675   :  { %v1706_v34 = vmul.f32 %v2657_v39, %v1704_v53 }
0x1677   :  { %v1818_v55 = vrot.slane %v1706_v34, 2  ;;  %v1810_v56 = vpop.permute.xlu0 %1809 }
0x1678   :  { %v1812_v57 = vmul.f32 %v2659_v41, %v1810_v56 }
0x1679   :  { %1819 = vrot.lane.b32.xlu0 %v1818_v55, %s2800_s30 }
0x167a   :  { %1814 = vrot.lane.b32.xlu1 %v1812_v57, %s2801_s5 }
0x16eb   :  { %v1820_v59 = vpop.permute.xlu0 %1819 }
0x16ec   :  { %v1815_v60 = vpop.permute.xlu1 %1814 }
0x16ed   :  { %v1822_v61 = vsel %vm132_vm1, %v1815_v60, %v1820_v59 }
0x16ee   :  { %v1824_v62 = vrot.slane %v1822_v61, 6 }
0x16f0   :  { %2376 = vmatmul.mubr.msk.f32.vlgmr.msra.gmra.mrb[16].mxu1 %vm336_vm2, %v1824_v62 }
0x17c3   :  { %v1893_v0 = vpop.f32.mrb[16].mxu1 }
0x17c4   :  { %v1894_v1 = vadd.f32 %v3003_v63, %v1893_v0  ;;  %v2377_v2 = vpop.f32.mrb[17].mxu1 }
0x17c6   :  { %2664 = vtanh.f32 %v1894_v1  ;;  %v2006_v4 = vmul.f32 -1.442695, %v1894_v1 }
0x17c8   :  { %2666 = vpow2.f32 %v2006_v4 }
0x17d0   :  { %v2665_v3 = vpop.eup %2664 }
0x17d1   :  { %1906 = vrot.lane.b32.xlu1 %v2665_v3, %s2800_s30 }
0x17d2   :  { %v2667_v5 = vpop.eup %2666 }
0x17d3   :  { %v1900_v6 = vadd.f32 1.0, %v2667_v5 }
0x17d5   :  { %2668 = vrcp.f32 %v1900_v6 }
0x17df   :  { %v2669_v7 = vpop.eup %2668 }
0x17e0   :  { %v1904_v11 = vmul.f32 %v2669_v7, %v1700_v46 }
0x1843   :  { %v1907_v8 = vpop.permute.xlu1 %1906 }
0x1844   :  { %v1909_v10 = vmul.f32 %v2669_v7, %v1907_v8 }
0x1846   :  { %1911 = vrot.lane.b32.xlu0 %v1909_v10, %s2801_s5 }
0x18b8   :  { %v1912_v12 = vpop.permute.xlu0 %1911 }
0x18b9   :  { %v1914_v14 = vadd.f32 %v1912_v12, %v1904_v11 }
0x18bb   :  { %2670 = vtanh.f32 %v1914_v14 }
0x18c5   :  { %v2671_v63 = vpop.eup %2670 }
0x18c6   :  { %1917 = vrot.lane.b32.xlu1 %v2671_v63, %s2800_s30 }
0x1938   :  { %v1918_v15 = vpop.permute.xlu1 %1917 }
0x1939   :  { %v1920_v18 = vmul.f32 %v2669_v7, %v1918_v15 }
0x193b   :  { %v1922_v19 = vrot.slane %v1920_v18, 2 }
0x193d   :  { %1923 = vrot.lane.b32.xlu0 %v1922_v19, %s2800_s30 }
0x19af   :  { %v1924_v21 = vpop.permute.xlu0 %1923 }
0x19b0   :  { %v1926_v22 = vsel %vm132_vm1, %v1815_v60, %v1924_v21 }
0x19b1   :  { %v1934_v23 = vmul.f32 %v2007_v20, %v1926_v22 }
0x19b3   :  { %v1936_v24 = vsel %vm1935_vm3, %v1934_v23, 0.0 }
0x19b4   :  { %1937 = vadd.xlane.f32.xlu1 %v1936_v24 }
0x1a41   :  { %v1938_v26 = vpop.xlane.xlu1 %1937 }
0x1a42   :  { %v1946_v27 = vadd.f32 %v2008_v25, %v1938_v26 }
0x1a44   :  { %1949 = vperm.xlu0 %2543, %v1946_v27  }
0x1ac3   :  { %v1950_v28 = vpop.permute.xlu0 %1949 }
0x1ac4   :  { %1952 = vst [vmem:[#allocation11 - $0x6] sm:$0xc0] %v1950_v28 }
0x1ac5   :  { %2771 = shalt.err (!%p2768_p8)
}
0x1ac6   :  { %s2772_s2 = scalar_lea.hbm %s3268_s10, 32 }
0x1ac7   :  { %p2773_p9 = scmp.ne.s32.totalorder %s3268_s10, %s2772_s2  ;;  %p2776_p10 = scmp.lt.u32.totalorder %s2772_s2, %s3268_s10 }
0x1ac9   :  { %p2778_p11 = pnand %p2776_p10, %p2773_p9 }
0x1acb   :  { %2781 = shalt.err (!%p2778_p11)
}
0x1acc   :  { %1962 = dma.vmem_to_hbm [thread:$0]  %s1960_s15, 32, %s3268_s10, [#allocation5]  }
0x1acd   :  { %2788 = dma.done.wait [#allocation5], 32  }
0x1ace   :  { %2789 = vsyncadd [#allocation5], 4294967264 }
0x1acf   :  { %1966 = vsyncpa [#allocation4], 1 }
0x1ad0   :  { %1967 = vsyncpa [#allocation7], 1 }
0x1ad1   :  { %1968 = vsyncpa [#allocation10], 1 }
0x1ad2   :  { %1969 = vsyncpa [#allocation5], 1 }

</bundles_post_ra>
